<compile_context>
chip_gen: v7x
topology: tpu7x:2x2x1
jax: 0.10.0
libtpu: 0.0.40
codegen_flags: <defaults>
</compile_context>

<pallas_src>
import math

import jax
import jax.numpy as jnp
from jax.experimental import pallas as pl
from jax.experimental.pallas import tpu as pltpu


def _leaky(v):
    # LeakyReLU(0.2)
    return jnp.where(v > 0, v, 0.2 * v)


def _make_kernel(B, C, Cp):
    """Build the step=0 Discriminator kernel for static (B, C, Cp)."""
    HW = 16                       # 4x4 spatial positions
    R = B * HW                    # rows, r = b*16 + y*4 + x
    inv_b = 1.0 / float(B)
    inv_n = 1.0 / float(C * HW)   # stddev mean over C*4*4 entries
    f32 = jnp.float32
    bf16 = jnp.bfloat16

    def kernel(x_ref, wrgb_ref, brgb_ref, w1_ref, b1_ref, w2_ref, b2_ref,
               wlin_ref, blin_ref, out_ref):
        # ---- in-kernel index helpers (replaces last-dim-1 mask inputs) ----
        lane = jax.lax.broadcasted_iota(jnp.int32, (1, Cp), 1)
        cmask = (lane < C).astype(f32)          # real feature lanes (for stddev mean)
        std_lane = (lane == C).astype(f32)      # lane holding the stddev channel

        row = jax.lax.broadcasted_iota(jnp.int32, (R, 1), 0)
        py = (row >> 2) & 3                     # y = (r % 16) // 4
        px = row & 3                            # x = r % 4

        # ---- from_rgb: 1x1 EqualConv2d over all B*4*4 pixels in one shot ----
        rgb = x_ref[...] * wrgb_ref[...] + brgb_ref[...]            # (R, Cp) f32

        # ---- minibatch stddev: single pass sum / sum-of-squares over the batch ----
        s = rgb[0:HW, :]
        ss = s * s
        for b in range(1, B):
            blk = rgb[b * HW:(b + 1) * HW, :]
            s = s + blk
            ss = ss + blk * blk
        mean = s * inv_b
        var = jnp.maximum(ss * inv_b - mean * mean, 0.0)             # population var (unbiased=False)
        std = jnp.sqrt(var + 1e-8)                                   # (HW, Cp)
        mean_std = jnp.sum(std * cmask, keepdims=True) * inv_n       # (1, 1)

        # stddev channel lives in lane C of the slab; padded lanes stay 0
        act = rgb + mean_std * std_lane                              # (R, Cp) f32

        # ---- im2col for the 3x3/pad=1 conv: 9 rolled + masked lane blocks ----
        # Rows that wrap around in the roll are always invalid taps, so the
        # per-tap validity mask already zeroes them.
        pieces = []
        for dy in range(3):
            for dx in range(3):
                off = (dy - 1) * 4 + (dx - 1)
                if off == 0:
                    shifted = act
                else:
                    shifted = pltpu.roll(act, shift=(-off) % R, axis=0)
                yv = py + (dy - 1)
                xv = px + (dx - 1)
                valid = ((yv >= 0) & (yv <= 3) & (xv >= 0) & (xv <= 3)).astype(f32)
                pieces.append((shifted * valid).astype(bf16))        # (R, Cp) bf16
        patches = jnp.concatenate(pieces, axis=1)                    # (R, 9*Cp) bf16

        # ---- conv1 (3x3, pad 1) as ONE bf16 matmul (f32 accumulation) + LeakyReLU ----
        h1 = jnp.dot(patches, w1_ref[...],
                     preferred_element_type=f32) + b1_ref[...]
        h1 = _leaky(h1)                                              # (R, C) f32

        # ---- conv2 (4x4, pad 0 -> 1x1): 16 accumulated (B,C)x(C,C) bf16 dots ----
        h3 = h1.reshape(B, HW, C)                                    # split leading dim only
        o2 = jnp.zeros((B, C), f32)
        for p in range(HW):
            hp = h3[:, p, :].astype(bf16)                            # (B, C)
            wp = w2_ref[p * C:(p + 1) * C, :]                        # (C, C) bf16, aligned slice
            o2 = o2 + jnp.dot(hp, wp, preferred_element_type=f32)
        o2 = _leaky(o2 + b2_ref[...])                                # (B, C) f32

        # ---- EqualLinear(C, 1): lane reduce on the VPU, single (B, 1) store ----
        out_ref[...] = (jnp.sum(o2 * wlin_ref[...], axis=1, keepdims=True)
                        + blin_ref[...])

    return kernel


def discriminator_forward(x_nchw, w_rgb, b_rgb, w1, b1, w2, b2, w_lin, b_lin):
    f32 = jnp.float32
    bf16 = jnp.bfloat16
    B = x_nchw.shape[0]
    C = w_rgb.shape[0]
    assert x_nchw.shape == (B, 1, 4, 4), "step=0 path expects (B, 1, 4, 4) input"
    HW = 16
    R = B * HW
    Cp = 128 * ((C + 1 + 127) // 128)   # lane-dense input-channel slab (C feats + stddev ch)

    # EqualLR scales (sqrt(2 / fan_in)) folded into the weights
    s_rgb = math.sqrt(2.0 / 1.0)
    s1 = math.sqrt(2.0 / ((C + 1) * 9))
    s2 = math.sqrt(2.0 / (C * 16))
    s_lin = math.sqrt(2.0 / C)

    # input rows ordered r = b*16 + y*4 + x
    x2d = jnp.transpose(x_nchw.astype(f32), (0, 2, 3, 1)).reshape(R, 1)

    wrgb_k = jnp.zeros((1, Cp), f32).at[0, :C].set(jnp.reshape(w_rgb, (C,)).astype(f32) * s_rgb)
    brgb_k = jnp.zeros((1, Cp), f32).at[0, :C].set(b_rgb.astype(f32))

    # conv weights as matmul operands: bf16, input channels padded to Cp on the K side,
    # output channels kept at C (no N padding -> ~6x less weight DMA than padded f32)
    w1_t = jnp.transpose(w1.astype(f32) * s1, (2, 3, 1, 0))                 # (3,3,C+1,C)
    w1_k = (jnp.zeros((3, 3, Cp, C), f32).at[:, :, :C + 1, :].set(w1_t)
            .reshape(9 * Cp, C).astype(bf16))                               # (9*Cp, C) bf16
    b1_k = jnp.reshape(b1.astype(f32), (1, C))
    w2_k = (jnp.transpose(w2.astype(f32) * s2, (2, 3, 1, 0))                # (4,4,C,C)
            .reshape(16 * C, C).astype(bf16))                               # (16*C, C) bf16
    b2_k = jnp.reshape(b2.astype(f32), (1, C))
    wlin_k = jnp.reshape(w_lin.astype(f32) * s_lin, (1, C))
    blin_k = jnp.reshape(b_lin.astype(f32), (1, 1))

    args = (x2d, wrgb_k, brgb_k, w1_k, b1_k, w2_k, b2_k, wlin_k, blin_k)

    def full_block(a):
        nd = a.ndim
        return pl.BlockSpec(tuple(a.shape), lambda i, _n=nd: (0,) * _n)

    return pl.pallas_call(
        _make_kernel(B, C, Cp),
        out_shape=jax.ShapeDtypeStruct((B, 1), f32),
        grid=(1,),
        in_specs=[full_block(a) for a in args],
        out_specs=pl.BlockSpec((B, 1), lambda i: (0, 0)),
        compiler_params=pltpu.CompilerParams(dimension_semantics=("arbitrary",)),
    )(*args)


def reference_forward(x, w_rgb, b_rgb, w1, b1, w2, b2, w_lin, b_lin):
    """Independent pure-JAX (NCHW, lax.conv) reference of the PyTorch forward."""
    C = w_rgb.shape[0]
    B = x.shape[0]
    s_rgb = math.sqrt(2.0)
    s1 = math.sqrt(2.0 / ((C + 1) * 9))
    s2 = math.sqrt(2.0 / (C * 16))
    s_lin = math.sqrt(2.0 / C)

    def conv(xx, w, b, pad):
        y = jax.lax.conv_general_dilated(
            xx, w, (1, 1), ((pad, pad), (pad, pad)),
            dimension_numbers=("NCHW", "OIHW", "NCHW"),
            precision=jax.lax.Precision.HIGHEST)
        return y + b.reshape(1, -1, 1, 1)

    out = conv(x, w_rgb * s_rgb, b_rgb, 0)                                 # (B, C, 4, 4)
    out_std = jnp.sqrt(jnp.var(out, axis=0) + 1e-8)                        # population var
    mean_std = jnp.mean(out_std)
    out = jnp.concatenate(
        [out, jnp.full((B, 1, 4, 4), mean_std, jnp.float32)], axis=1)      # (B, C+1, 4, 4)
    out = _leaky(conv(out, w1 * s1, b1, 1))                                # (B, C, 4, 4)
    out = _leaky(conv(out, w2 * s2, b2, 0))                                # (B, C, 1, 1)
    out = out[:, :, 0, 0]                                                  # (B, C)
    return jnp.dot(out, (w_lin * s_lin).T,
                   precision=jax.lax.Precision.HIGHEST) + b_lin.reshape(1, 1)


if __name__ == "__main__":
    B, C = 2, 64   # feat_dim = 64 (module default); step=0 -> 4x4 single-channel input
    key = jax.random.PRNGKey(0)
    k = jax.random.split(key, 5)

    # PyTorch-layout parameters (EqualConv2d / EqualLinear init: weight ~ N(0,1), bias = 0)
    w_rgb = jax.random.normal(k[0], (C, 1, 1, 1), jnp.float32)     # from_rgb[3]
    b_rgb = jnp.zeros((C,), jnp.float32)
    w1 = jax.random.normal(k[1], (C, C + 1, 3, 3), jnp.float32)    # progression[3] conv1
    b1 = jnp.zeros((C,), jnp.float32)
    w2 = jax.random.normal(k[2], (C, C, 4, 4), jnp.float32)        # progression[3] conv2
    b2 = jnp.zeros((C,), jnp.float32)
    w_lin = jax.random.normal(k[3], (1, C), jnp.float32)           # EqualLinear(C, 1)
    b_lin = jnp.zeros((1,), jnp.float32)

    x = jax.random.normal(k[4], (B, 1, 4, 4), jnp.float32)         # NCHW input

    out = discriminator_forward(x, w_rgb, b_rgb, w1, b1, w2, b2, w_lin, b_lin)
    out = jax.block_until_ready(out)

    ref = reference_forward(x, w_rgb, b_rgb, w1, b1, w2, b2, w_lin, b_lin)
    assert out.shape == (B, 1)
    # kernel uses bf16 weights (f32 accumulation); reference is full f32 -> looser tolerance
    assert bool(jnp.allclose(out, ref, rtol=5e-2, atol=5e-2)), (out, ref)
    print("KERNEL_OK")
</pallas_src>

<mosaic_0001>
module attributes {stable_mosaic.version = 11 : i64} {
  func.func @kernel(%arg0: i32, %arg1: memref<32x1xf32, #tpu.memory_space<vmem>>, %arg2: memref<1x128xf32, #tpu.memory_space<vmem>>, %arg3: memref<1x128xf32, #tpu.memory_space<vmem>>, %arg4: memref<1152x64xbf16, #tpu.memory_space<vmem>>, %arg5: memref<1x64xf32, #tpu.memory_space<vmem>>, %arg6: memref<1024x64xbf16, #tpu.memory_space<vmem>>, %arg7: memref<1x64xf32, #tpu.memory_space<vmem>>, %arg8: memref<1x64xf32, #tpu.memory_space<vmem>>, %arg9: memref<1x1xf32, #tpu.memory_space<vmem>>, %arg10: memref<2x1xf32, #tpu.memory_space<vmem>>) attributes {dimension_semantics = [#tpu.dimension_semantics<arbitrary>], iteration_bounds = array<i64: 1>, scalar_prefetch = 0 : i64, scratch_operands = 0 : i64, tpu.core_type = #tpu.core_type<tc>, window_params = [{pipeline_mode = #tpu.pipeline_mode<synchronous>, transform_indices = @transform_0, window_bounds = array<i64: 32, 1>}, {pipeline_mode = #tpu.pipeline_mode<synchronous>, transform_indices = @transform_1, window_bounds = array<i64: 1, 128>}, {pipeline_mode = #tpu.pipeline_mode<synchronous>, transform_indices = @transform_2, window_bounds = array<i64: 1, 128>}, {pipeline_mode = #tpu.pipeline_mode<synchronous>, transform_indices = @transform_3, window_bounds = array<i64: 1152, 64>}, {pipeline_mode = #tpu.pipeline_mode<synchronous>, transform_indices = @transform_4, window_bounds = array<i64: 1, 64>}, {pipeline_mode = #tpu.pipeline_mode<synchronous>, transform_indices = @transform_5, window_bounds = array<i64: 1024, 64>}, {pipeline_mode = #tpu.pipeline_mode<synchronous>, transform_indices = @transform_6, window_bounds = array<i64: 1, 64>}, {pipeline_mode = #tpu.pipeline_mode<synchronous>, transform_indices = @transform_7, window_bounds = array<i64: 1, 64>}, {pipeline_mode = #tpu.pipeline_mode<synchronous>, transform_indices = @transform_8, window_bounds = array<i64: 1, 1>}, {pipeline_mode = #tpu.pipeline_mode<synchronous>, transform_indices = @transform_9, window_bounds = array<i64: 2, 1>}]} {
    %0 = tpu.iota {dimensions = array<i32: 1>} : vector<1x128xi32>
    %c64_i32 = arith.constant 64 : i32
    %1 = vector.broadcast %c64_i32 : i32 to vector<1x128xi32>
    %2 = arith.cmpi slt, %0, %1 : vector<1x128xi32>
    %3 = arith.extui %2 : vector<1x128xi1> to vector<1x128xi32>
    %4 = arith.sitofp %3 : vector<1x128xi32> to vector<1x128xf32>
    %c64_i32_0 = arith.constant 64 : i32
    %5 = vector.broadcast %c64_i32_0 : i32 to vector<1x128xi32>
    %6 = arith.cmpi eq, %0, %5 : vector<1x128xi32>
    %7 = arith.extui %6 : vector<1x128xi1> to vector<1x128xi32>
    %8 = arith.sitofp %7 : vector<1x128xi32> to vector<1x128xf32>
    %9 = tpu.iota {dimensions = array<i32: 0>} : vector<32x1xi32>
    %c2_i32 = arith.constant 2 : i32
    %10 = vector.broadcast %c2_i32 : i32 to vector<32x1xi32>
    %11 = arith.shrsi %9, %10 : vector<32x1xi32>
    %c3_i32 = arith.constant 3 : i32
    %12 = vector.broadcast %c3_i32 : i32 to vector<32x1xi32>
    %13 = arith.andi %11, %12 : vector<32x1xi32>
    %c3_i32_1 = arith.constant 3 : i32
    %14 = vector.broadcast %c3_i32_1 : i32 to vector<32x1xi32>
    %15 = arith.andi %9, %14 : vector<32x1xi32>
    %c0 = arith.constant 0 : index
    %c0_2 = arith.constant 0 : index
    %16 = vector.load %arg1[%c0, %c0_2] : memref<32x1xf32, #tpu.memory_space<vmem>>, vector<32x1xf32>
    %c0_3 = arith.constant 0 : index
    %c0_4 = arith.constant 0 : index
    %17 = vector.load %arg2[%c0_3, %c0_4] : memref<1x128xf32, #tpu.memory_space<vmem>>, vector<1x128xf32>
    %18 = vector.broadcast %16 : vector<32x1xf32> to vector<32x128xf32>
    %19 = vector.broadcast %17 : vector<1x128xf32> to vector<32x128xf32>
    %20 = arith.mulf %18, %19 : vector<32x128xf32>
    %c0_5 = arith.constant 0 : index
    %c0_6 = arith.constant 0 : index
    %21 = vector.load %arg3[%c0_5, %c0_6] : memref<1x128xf32, #tpu.memory_space<vmem>>, vector<1x128xf32>
    %22 = vector.broadcast %21 : vector<1x128xf32> to vector<32x128xf32>
    %23 = arith.addf %20, %22 : vector<32x128xf32>
    %24 = vector.extract_strided_slice %23 {offsets = [0, 0], sizes = [16, 128], strides = [1, 1]} : vector<32x128xf32> to vector<16x128xf32>
    %25 = arith.mulf %24, %24 : vector<16x128xf32>
    %26 = vector.extract_strided_slice %23 {offsets = [16, 0], sizes = [16, 128], strides = [1, 1]} : vector<32x128xf32> to vector<16x128xf32>
    %27 = arith.addf %24, %26 : vector<16x128xf32>
    %28 = arith.mulf %26, %26 : vector<16x128xf32>
    %29 = arith.addf %25, %28 : vector<16x128xf32>
    %cst = arith.constant 5.000000e-01 : f32
    %30 = vector.broadcast %cst : f32 to vector<16x128xf32>
    %31 = arith.mulf %27, %30 : vector<16x128xf32>
    %cst_7 = arith.constant 5.000000e-01 : f32
    %32 = vector.broadcast %cst_7 : f32 to vector<16x128xf32>
    %33 = arith.mulf %29, %32 : vector<16x128xf32>
    %34 = arith.mulf %31, %31 : vector<16x128xf32>
    %35 = arith.subf %33, %34 : vector<16x128xf32>
    %cst_8 = arith.constant 0.000000e+00 : f32
    %36 = vector.broadcast %cst_8 : f32 to vector<16x128xf32>
    %37 = arith.maximumf %35, %36 : vector<16x128xf32>
    %cst_9 = arith.constant 9.99999993E-9 : f32
    %38 = vector.broadcast %cst_9 : f32 to vector<16x128xf32>
    %39 = arith.addf %37, %38 : vector<16x128xf32>
    %40 = math.sqrt %39 : vector<16x128xf32>
    %41 = vector.broadcast %4 : vector<1x128xf32> to vector<16x128xf32>
    %42 = arith.mulf %40, %41 : vector<16x128xf32>
    %43 = vector.shape_cast %42 : vector<16x128xf32> to vector<1x16x128xf32>
    %cst_10 = arith.constant dense<0.000000e+00> : vector<1xf32>
    %44 = vector.multi_reduction <add>, %43, %cst_10 [1, 2] : vector<1x16x128xf32> to vector<1xf32>
    %45 = vector.shape_cast %44 : vector<1xf32> to vector<1x1x1xf32>
    %46 = vector.extract %45[0, 0, 0] : f32 from vector<1x1x1xf32>
    %47 = vector.broadcast %46 : f32 to vector<1x1xf32>
    %cst_11 = arith.constant 9.765625E-4 : f32
    %48 = vector.broadcast %cst_11 : f32 to vector<1x1xf32>
    %49 = arith.mulf %47, %48 : vector<1x1xf32>
    %50 = vector.broadcast %49 : vector<1x1xf32> to vector<1x128xf32>
    %51 = arith.mulf %50, %8 : vector<1x128xf32>
    %52 = vector.broadcast %51 : vector<1x128xf32> to vector<32x128xf32>
    %53 = arith.addf %23, %52 : vector<32x128xf32>
    %c5_i32 = arith.constant 5 : i32
    %54 = tpu.dynamic_rotate %53 by %c5_i32 dim 0 : vector<32x128xf32>, i32 -> vector<32x128xf32>
    %c-1_i32 = arith.constant -1 : i32
    %55 = vector.broadcast %c-1_i32 : i32 to vector<32x1xi32>
    %56 = arith.addi %13, %55 : vector<32x1xi32>
    %c-1_i32_12 = arith.constant -1 : i32
    %57 = vector.broadcast %c-1_i32_12 : i32 to vector<32x1xi32>
    %58 = arith.addi %15, %57 : vector<32x1xi32>
    %c0_i32 = arith.constant 0 : i32
    %59 = vector.broadcast %c0_i32 : i32 to vector<32x1xi32>
    %60 = arith.cmpi sge, %56, %59 : vector<32x1xi32>
    %c3_i32_13 = arith.constant 3 : i32
    %61 = vector.broadcast %c3_i32_13 : i32 to vector<32x1xi32>
    %62 = arith.cmpi sle, %56, %61 : vector<32x1xi32>
    %63 = arith.andi %60, %62 : vector<32x1xi1>
    %c0_i32_14 = arith.constant 0 : i32
    %64 = vector.broadcast %c0_i32_14 : i32 to vector<32x1xi32>
    %65 = arith.cmpi sge, %58, %64 : vector<32x1xi32>
    %66 = arith.andi %63, %65 : vector<32x1xi1>
    %c3_i32_15 = arith.constant 3 : i32
    %67 = vector.broadcast %c3_i32_15 : i32 to vector<32x1xi32>
    %68 = arith.cmpi sle, %58, %67 : vector<32x1xi32>
    %69 = arith.andi %66, %68 : vector<32x1xi1>
    %70 = arith.extui %69 : vector<32x1xi1> to vector<32x1xi32>
    %71 = arith.sitofp %70 : vector<32x1xi32> to vector<32x1xf32>
    %72 = vector.broadcast %71 : vector<32x1xf32> to vector<32x128xf32>
    %73 = arith.mulf %54, %72 : vector<32x128xf32>
    %74 = arith.truncf %73 : vector<32x128xf32> to vector<32x128xbf16>
    %c4_i32 = arith.constant 4 : i32
    %75 = tpu.dynamic_rotate %53 by %c4_i32 dim 0 : vector<32x128xf32>, i32 -> vector<32x128xf32>
    %c-1_i32_16 = arith.constant -1 : i32
    %76 = vector.broadcast %c-1_i32_16 : i32 to vector<32x1xi32>
    %77 = arith.addi %13, %76 : vector<32x1xi32>
    %c0_i32_17 = arith.constant 0 : i32
    %78 = vector.broadcast %c0_i32_17 : i32 to vector<32x1xi32>
    %79 = arith.addi %15, %78 : vector<32x1xi32>
    %c0_i32_18 = arith.constant 0 : i32
    %80 = vector.broadcast %c0_i32_18 : i32 to vector<32x1xi32>
    %81 = arith.cmpi sge, %77, %80 : vector<32x1xi32>
    %c3_i32_19 = arith.constant 3 : i32
    %82 = vector.broadcast %c3_i32_19 : i32 to vector<32x1xi32>
    %83 = arith.cmpi sle, %77, %82 : vector<32x1xi32>
    %84 = arith.andi %81, %83 : vector<32x1xi1>
    %c0_i32_20 = arith.constant 0 : i32
    %85 = vector.broadcast %c0_i32_20 : i32 to vector<32x1xi32>
    %86 = arith.cmpi sge, %79, %85 : vector<32x1xi32>
    %87 = arith.andi %84, %86 : vector<32x1xi1>
    %c3_i32_21 = arith.constant 3 : i32
    %88 = vector.broadcast %c3_i32_21 : i32 to vector<32x1xi32>
    %89 = arith.cmpi sle, %79, %88 : vector<32x1xi32>
    %90 = arith.andi %87, %89 : vector<32x1xi1>
    %91 = arith.extui %90 : vector<32x1xi1> to vector<32x1xi32>
    %92 = arith.sitofp %91 : vector<32x1xi32> to vector<32x1xf32>
    %93 = vector.broadcast %92 : vector<32x1xf32> to vector<32x128xf32>
    %94 = arith.mulf %75, %93 : vector<32x128xf32>
    %95 = arith.truncf %94 : vector<32x128xf32> to vector<32x128xbf16>
    %c3_i32_22 = arith.constant 3 : i32
    %96 = tpu.dynamic_rotate %53 by %c3_i32_22 dim 0 : vector<32x128xf32>, i32 -> vector<32x128xf32>
    %c-1_i32_23 = arith.constant -1 : i32
    %97 = vector.broadcast %c-1_i32_23 : i32 to vector<32x1xi32>
    %98 = arith.addi %13, %97 : vector<32x1xi32>
    %c1_i32 = arith.constant 1 : i32
    %99 = vector.broadcast %c1_i32 : i32 to vector<32x1xi32>
    %100 = arith.addi %15, %99 : vector<32x1xi32>
    %c0_i32_24 = arith.constant 0 : i32
    %101 = vector.broadcast %c0_i32_24 : i32 to vector<32x1xi32>
    %102 = arith.cmpi sge, %98, %101 : vector<32x1xi32>
    %c3_i32_25 = arith.constant 3 : i32
    %103 = vector.broadcast %c3_i32_25 : i32 to vector<32x1xi32>
    %104 = arith.cmpi sle, %98, %103 : vector<32x1xi32>
    %105 = arith.andi %102, %104 : vector<32x1xi1>
    %c0_i32_26 = arith.constant 0 : i32
    %106 = vector.broadcast %c0_i32_26 : i32 to vector<32x1xi32>
    %107 = arith.cmpi sge, %100, %106 : vector<32x1xi32>
    %108 = arith.andi %105, %107 : vector<32x1xi1>
    %c3_i32_27 = arith.constant 3 : i32
    %109 = vector.broadcast %c3_i32_27 : i32 to vector<32x1xi32>
    %110 = arith.cmpi sle, %100, %109 : vector<32x1xi32>
    %111 = arith.andi %108, %110 : vector<32x1xi1>
    %112 = arith.extui %111 : vector<32x1xi1> to vector<32x1xi32>
    %113 = arith.sitofp %112 : vector<32x1xi32> to vector<32x1xf32>
    %114 = vector.broadcast %113 : vector<32x1xf32> to vector<32x128xf32>
    %115 = arith.mulf %96, %114 : vector<32x128xf32>
    %116 = arith.truncf %115 : vector<32x128xf32> to vector<32x128xbf16>
    %c1_i32_28 = arith.constant 1 : i32
    %117 = tpu.dynamic_rotate %53 by %c1_i32_28 dim 0 : vector<32x128xf32>, i32 -> vector<32x128xf32>
    %c0_i32_29 = arith.constant 0 : i32
    %118 = vector.broadcast %c0_i32_29 : i32 to vector<32x1xi32>
    %119 = arith.addi %13, %118 : vector<32x1xi32>
    %c-1_i32_30 = arith.constant -1 : i32
    %120 = vector.broadcast %c-1_i32_30 : i32 to vector<32x1xi32>
    %121 = arith.addi %15, %120 : vector<32x1xi32>
    %c0_i32_31 = arith.constant 0 : i32
    %122 = vector.broadcast %c0_i32_31 : i32 to vector<32x1xi32>
    %123 = arith.cmpi sge, %119, %122 : vector<32x1xi32>
    %c3_i32_32 = arith.constant 3 : i32
    %124 = vector.broadcast %c3_i32_32 : i32 to vector<32x1xi32>
    %125 = arith.cmpi sle, %119, %124 : vector<32x1xi32>
    %126 = arith.andi %123, %125 : vector<32x1xi1>
    %c0_i32_33 = arith.constant 0 : i32
    %127 = vector.broadcast %c0_i32_33 : i32 to vector<32x1xi32>
    %128 = arith.cmpi sge, %121, %127 : vector<32x1xi32>
    %129 = arith.andi %126, %128 : vector<32x1xi1>
    %c3_i32_34 = arith.constant 3 : i32
    %130 = vector.broadcast %c3_i32_34 : i32 to vector<32x1xi32>
    %131 = arith.cmpi sle, %121, %130 : vector<32x1xi32>
    %132 = arith.andi %129, %131 : vector<32x1xi1>
    %133 = arith.extui %132 : vector<32x1xi1> to vector<32x1xi32>
    %134 = arith.sitofp %133 : vector<32x1xi32> to vector<32x1xf32>
    %135 = vector.broadcast %134 : vector<32x1xf32> to vector<32x128xf32>
    %136 = arith.mulf %117, %135 : vector<32x128xf32>
    %137 = arith.truncf %136 : vector<32x128xf32> to vector<32x128xbf16>
    %c0_i32_35 = arith.constant 0 : i32
    %138 = vector.broadcast %c0_i32_35 : i32 to vector<32x1xi32>
    %139 = arith.addi %13, %138 : vector<32x1xi32>
    %c0_i32_36 = arith.constant 0 : i32
    %140 = vector.broadcast %c0_i32_36 : i32 to vector<32x1xi32>
    %141 = arith.addi %15, %140 : vector<32x1xi32>
    %c0_i32_37 = arith.constant 0 : i32
    %142 = vector.broadcast %c0_i32_37 : i32 to vector<32x1xi32>
    %143 = arith.cmpi sge, %139, %142 : vector<32x1xi32>
    %c3_i32_38 = arith.constant 3 : i32
    %144 = vector.broadcast %c3_i32_38 : i32 to vector<32x1xi32>
    %145 = arith.cmpi sle, %139, %144 : vector<32x1xi32>
    %146 = arith.andi %143, %145 : vector<32x1xi1>
    %c0_i32_39 = arith.constant 0 : i32
    %147 = vector.broadcast %c0_i32_39 : i32 to vector<32x1xi32>
    %148 = arith.cmpi sge, %141, %147 : vector<32x1xi32>
    %149 = arith.andi %146, %148 : vector<32x1xi1>
    %c3_i32_40 = arith.constant 3 : i32
    %150 = vector.broadcast %c3_i32_40 : i32 to vector<32x1xi32>
    %151 = arith.cmpi sle, %141, %150 : vector<32x1xi32>
    %152 = arith.andi %149, %151 : vector<32x1xi1>
    %153 = arith.extui %152 : vector<32x1xi1> to vector<32x1xi32>
    %154 = arith.sitofp %153 : vector<32x1xi32> to vector<32x1xf32>
    %155 = vector.broadcast %154 : vector<32x1xf32> to vector<32x128xf32>
    %156 = arith.mulf %53, %155 : vector<32x128xf32>
    %157 = arith.truncf %156 : vector<32x128xf32> to vector<32x128xbf16>
    %c31_i32 = arith.constant 31 : i32
    %158 = tpu.dynamic_rotate %53 by %c31_i32 dim 0 : vector<32x128xf32>, i32 -> vector<32x128xf32>
    %c0_i32_41 = arith.constant 0 : i32
    %159 = vector.broadcast %c0_i32_41 : i32 to vector<32x1xi32>
    %160 = arith.addi %13, %159 : vector<32x1xi32>
    %c1_i32_42 = arith.constant 1 : i32
    %161 = vector.broadcast %c1_i32_42 : i32 to vector<32x1xi32>
    %162 = arith.addi %15, %161 : vector<32x1xi32>
    %c0_i32_43 = arith.constant 0 : i32
    %163 = vector.broadcast %c0_i32_43 : i32 to vector<32x1xi32>
    %164 = arith.cmpi sge, %160, %163 : vector<32x1xi32>
    %c3_i32_44 = arith.constant 3 : i32
    %165 = vector.broadcast %c3_i32_44 : i32 to vector<32x1xi32>
    %166 = arith.cmpi sle, %160, %165 : vector<32x1xi32>
    %167 = arith.andi %164, %166 : vector<32x1xi1>
    %c0_i32_45 = arith.constant 0 : i32
    %168 = vector.broadcast %c0_i32_45 : i32 to vector<32x1xi32>
    %169 = arith.cmpi sge, %162, %168 : vector<32x1xi32>
    %170 = arith.andi %167, %169 : vector<32x1xi1>
    %c3_i32_46 = arith.constant 3 : i32
    %171 = vector.broadcast %c3_i32_46 : i32 to vector<32x1xi32>
    %172 = arith.cmpi sle, %162, %171 : vector<32x1xi32>
    %173 = arith.andi %170, %172 : vector<32x1xi1>
    %174 = arith.extui %173 : vector<32x1xi1> to vector<32x1xi32>
    %175 = arith.sitofp %174 : vector<32x1xi32> to vector<32x1xf32>
    %176 = vector.broadcast %175 : vector<32x1xf32> to vector<32x128xf32>
    %177 = arith.mulf %158, %176 : vector<32x128xf32>
    %178 = arith.truncf %177 : vector<32x128xf32> to vector<32x128xbf16>
    %c29_i32 = arith.constant 29 : i32
    %179 = tpu.dynamic_rotate %53 by %c29_i32 dim 0 : vector<32x128xf32>, i32 -> vector<32x128xf32>
    %c1_i32_47 = arith.constant 1 : i32
    %180 = vector.broadcast %c1_i32_47 : i32 to vector<32x1xi32>
    %181 = arith.addi %13, %180 : vector<32x1xi32>
    %c-1_i32_48 = arith.constant -1 : i32
    %182 = vector.broadcast %c-1_i32_48 : i32 to vector<32x1xi32>
    %183 = arith.addi %15, %182 : vector<32x1xi32>
    %c0_i32_49 = arith.constant 0 : i32
    %184 = vector.broadcast %c0_i32_49 : i32 to vector<32x1xi32>
    %185 = arith.cmpi sge, %181, %184 : vector<32x1xi32>
    %c3_i32_50 = arith.constant 3 : i32
    %186 = vector.broadcast %c3_i32_50 : i32 to vector<32x1xi32>
    %187 = arith.cmpi sle, %181, %186 : vector<32x1xi32>
    %188 = arith.andi %185, %187 : vector<32x1xi1>
    %c0_i32_51 = arith.constant 0 : i32
    %189 = vector.broadcast %c0_i32_51 : i32 to vector<32x1xi32>
    %190 = arith.cmpi sge, %183, %189 : vector<32x1xi32>
    %191 = arith.andi %188, %190 : vector<32x1xi1>
    %c3_i32_52 = arith.constant 3 : i32
    %192 = vector.broadcast %c3_i32_52 : i32 to vector<32x1xi32>
    %193 = arith.cmpi sle, %183, %192 : vector<32x1xi32>
    %194 = arith.andi %191, %193 : vector<32x1xi1>
    %195 = arith.extui %194 : vector<32x1xi1> to vector<32x1xi32>
    %196 = arith.sitofp %195 : vector<32x1xi32> to vector<32x1xf32>
    %197 = vector.broadcast %196 : vector<32x1xf32> to vector<32x128xf32>
    %198 = arith.mulf %179, %197 : vector<32x128xf32>
    %199 = arith.truncf %198 : vector<32x128xf32> to vector<32x128xbf16>
    %c28_i32 = arith.constant 28 : i32
    %200 = tpu.dynamic_rotate %53 by %c28_i32 dim 0 : vector<32x128xf32>, i32 -> vector<32x128xf32>
    %c1_i32_53 = arith.constant 1 : i32
    %201 = vector.broadcast %c1_i32_53 : i32 to vector<32x1xi32>
    %202 = arith.addi %13, %201 : vector<32x1xi32>
    %c0_i32_54 = arith.constant 0 : i32
    %203 = vector.broadcast %c0_i32_54 : i32 to vector<32x1xi32>
    %204 = arith.addi %15, %203 : vector<32x1xi32>
    %c0_i32_55 = arith.constant 0 : i32
    %205 = vector.broadcast %c0_i32_55 : i32 to vector<32x1xi32>
    %206 = arith.cmpi sge, %202, %205 : vector<32x1xi32>
    %c3_i32_56 = arith.constant 3 : i32
    %207 = vector.broadcast %c3_i32_56 : i32 to vector<32x1xi32>
    %208 = arith.cmpi sle, %202, %207 : vector<32x1xi32>
    %209 = arith.andi %206, %208 : vector<32x1xi1>
    %c0_i32_57 = arith.constant 0 : i32
    %210 = vector.broadcast %c0_i32_57 : i32 to vector<32x1xi32>
    %211 = arith.cmpi sge, %204, %210 : vector<32x1xi32>
    %212 = arith.andi %209, %211 : vector<32x1xi1>
    %c3_i32_58 = arith.constant 3 : i32
    %213 = vector.broadcast %c3_i32_58 : i32 to vector<32x1xi32>
    %214 = arith.cmpi sle, %204, %213 : vector<32x1xi32>
    %215 = arith.andi %212, %214 : vector<32x1xi1>
    %216 = arith.extui %215 : vector<32x1xi1> to vector<32x1xi32>
    %217 = arith.sitofp %216 : vector<32x1xi32> to vector<32x1xf32>
    %218 = vector.broadcast %217 : vector<32x1xf32> to vector<32x128xf32>
    %219 = arith.mulf %200, %218 : vector<32x128xf32>
    %220 = arith.truncf %219 : vector<32x128xf32> to vector<32x128xbf16>
    %c27_i32 = arith.constant 27 : i32
    %221 = tpu.dynamic_rotate %53 by %c27_i32 dim 0 : vector<32x128xf32>, i32 -> vector<32x128xf32>
    %c1_i32_59 = arith.constant 1 : i32
    %222 = vector.broadcast %c1_i32_59 : i32 to vector<32x1xi32>
    %223 = arith.addi %13, %222 : vector<32x1xi32>
    %c1_i32_60 = arith.constant 1 : i32
    %224 = vector.broadcast %c1_i32_60 : i32 to vector<32x1xi32>
    %225 = arith.addi %15, %224 : vector<32x1xi32>
    %c0_i32_61 = arith.constant 0 : i32
    %226 = vector.broadcast %c0_i32_61 : i32 to vector<32x1xi32>
    %227 = arith.cmpi sge, %223, %226 : vector<32x1xi32>
    %c3_i32_62 = arith.constant 3 : i32
    %228 = vector.broadcast %c3_i32_62 : i32 to vector<32x1xi32>
    %229 = arith.cmpi sle, %223, %228 : vector<32x1xi32>
    %230 = arith.andi %227, %229 : vector<32x1xi1>
    %c0_i32_63 = arith.constant 0 : i32
    %231 = vector.broadcast %c0_i32_63 : i32 to vector<32x1xi32>
    %232 = arith.cmpi sge, %225, %231 : vector<32x1xi32>
    %233 = arith.andi %230, %232 : vector<32x1xi1>
    %c3_i32_64 = arith.constant 3 : i32
    %234 = vector.broadcast %c3_i32_64 : i32 to vector<32x1xi32>
    %235 = arith.cmpi sle, %225, %234 : vector<32x1xi32>
    %236 = arith.andi %233, %235 : vector<32x1xi1>
    %237 = arith.extui %236 : vector<32x1xi1> to vector<32x1xi32>
    %238 = arith.sitofp %237 : vector<32x1xi32> to vector<32x1xf32>
    %239 = vector.broadcast %238 : vector<32x1xf32> to vector<32x128xf32>
    %240 = arith.mulf %221, %239 : vector<32x128xf32>
    %241 = arith.truncf %240 : vector<32x128xf32> to vector<32x128xbf16>
    %242 = tpu.concatenate %74, %95, %116, %137, %157, %178, %199, %220, %241 in 1 : vector<32x128xbf16>, vector<32x128xbf16>, vector<32x128xbf16>, vector<32x128xbf16>, vector<32x128xbf16>, vector<32x128xbf16>, vector<32x128xbf16>, vector<32x128xbf16>, vector<32x128xbf16> -> vector<32x1152xbf16>
    %c0_65 = arith.constant 0 : index
    %c0_66 = arith.constant 0 : index
    %243 = vector.load %arg4[%c0_65, %c0_66] : memref<1152x64xbf16, #tpu.memory_space<vmem>>, vector<1152x64xbf16>
    %cst_67 = arith.constant dense<0.000000e+00> : vector<32x64xf32>
    %244 = tpu.matmul %242, %243, %cst_67 {dimension_numbers = #tpu.dot_dimension_numbers<[1], [0], [0], [1], [0, 0, 1, 1], [], []>} : vector<32x1152xbf16>, vector<1152x64xbf16>, vector<32x64xf32> -> vector<32x64xf32>
    %c0_68 = arith.constant 0 : index
    %c0_69 = arith.constant 0 : index
    %245 = vector.load %arg5[%c0_68, %c0_69] : memref<1x64xf32, #tpu.memory_space<vmem>>, vector<1x64xf32>
    %246 = vector.broadcast %245 : vector<1x64xf32> to vector<32x64xf32>
    %247 = arith.addf %244, %246 : vector<32x64xf32>
    %cst_70 = arith.constant 0.000000e+00 : f32
    %248 = vector.broadcast %cst_70 : f32 to vector<32x64xf32>
    %249 = arith.cmpf ogt, %247, %248 : vector<32x64xf32>
    %cst_71 = arith.constant 2.000000e-01 : f32
    %250 = vector.broadcast %cst_71 : f32 to vector<32x64xf32>
    %251 = arith.mulf %250, %247 : vector<32x64xf32>
    %252 = arith.select %249, %247, %251 : vector<32x64xi1>, vector<32x64xf32>
    %253 = vector.shape_cast %252 : vector<32x64xf32> to vector<2x16x64xf32>
    %cst_72 = arith.constant 0.000000e+00 : f32
    %254 = vector.broadcast %cst_72 : f32 to vector<2x64xf32>
    %255 = vector.extract_strided_slice %253 {offsets = [0, 0, 0], sizes = [2, 1, 64], strides = [1, 1, 1]} : vector<2x16x64xf32> to vector<2x1x64xf32>
    %256 = vector.shape_cast %255 : vector<2x1x64xf32> to vector<2x64xf32>
    %257 = arith.truncf %256 : vector<2x64xf32> to vector<2x64xbf16>
    %c0_73 = arith.constant 0 : index
    %c0_74 = arith.constant 0 : index
    %258 = vector.load %arg6[%c0_73, %c0_74] : memref<1024x64xbf16, #tpu.memory_space<vmem>>, vector<64x64xbf16>
    %cst_75 = arith.constant dense<0.000000e+00> : vector<2x64xf32>
    %259 = tpu.matmul %257, %258, %cst_75 {dimension_numbers = #tpu.dot_dimension_numbers<[1], [0], [0], [1], [0, 0, 1, 1], [], []>} : vector<2x64xbf16>, vector<64x64xbf16>, vector<2x64xf32> -> vector<2x64xf32>
    %260 = arith.addf %254, %259 : vector<2x64xf32>
    %261 = vector.extract_strided_slice %253 {offsets = [0, 1, 0], sizes = [2, 1, 64], strides = [1, 1, 1]} : vector<2x16x64xf32> to vector<2x1x64xf32>
    %262 = vector.shape_cast %261 : vector<2x1x64xf32> to vector<2x64xf32>
    %263 = arith.truncf %262 : vector<2x64xf32> to vector<2x64xbf16>
    %c64 = arith.constant 64 : index
    %c0_76 = arith.constant 0 : index
    %264 = vector.load %arg6[%c64, %c0_76] : memref<1024x64xbf16, #tpu.memory_space<vmem>>, vector<64x64xbf16>
    %cst_77 = arith.constant dense<0.000000e+00> : vector<2x64xf32>
    %265 = tpu.matmul %263, %264, %cst_77 {dimension_numbers = #tpu.dot_dimension_numbers<[1], [0], [0], [1], [0, 0, 1, 1], [], []>} : vector<2x64xbf16>, vector<64x64xbf16>, vector<2x64xf32> -> vector<2x64xf32>
    %266 = arith.addf %260, %265 : vector<2x64xf32>
    %267 = vector.extract_strided_slice %253 {offsets = [0, 2, 0], sizes = [2, 1, 64], strides = [1, 1, 1]} : vector<2x16x64xf32> to vector<2x1x64xf32>
    %268 = vector.shape_cast %267 : vector<2x1x64xf32> to vector<2x64xf32>
    %269 = arith.truncf %268 : vector<2x64xf32> to vector<2x64xbf16>
    %c128 = arith.constant 128 : index
    %c0_78 = arith.constant 0 : index
    %270 = vector.load %arg6[%c128, %c0_78] : memref<1024x64xbf16, #tpu.memory_space<vmem>>, vector<64x64xbf16>
    %cst_79 = arith.constant dense<0.000000e+00> : vector<2x64xf32>
    %271 = tpu.matmul %269, %270, %cst_79 {dimension_numbers = #tpu.dot_dimension_numbers<[1], [0], [0], [1], [0, 0, 1, 1], [], []>} : vector<2x64xbf16>, vector<64x64xbf16>, vector<2x64xf32> -> vector<2x64xf32>
    %272 = arith.addf %266, %271 : vector<2x64xf32>
    %273 = vector.extract_strided_slice %253 {offsets = [0, 3, 0], sizes = [2, 1, 64], strides = [1, 1, 1]} : vector<2x16x64xf32> to vector<2x1x64xf32>
    %274 = vector.shape_cast %273 : vector<2x1x64xf32> to vector<2x64xf32>
    %275 = arith.truncf %274 : vector<2x64xf32> to vector<2x64xbf16>
    %c192 = arith.constant 192 : index
    %c0_80 = arith.constant 0 : index
    %276 = vector.load %arg6[%c192, %c0_80] : memref<1024x64xbf16, #tpu.memory_space<vmem>>, vector<64x64xbf16>
    %cst_81 = arith.constant dense<0.000000e+00> : vector<2x64xf32>
    %277 = tpu.matmul %275, %276, %cst_81 {dimension_numbers = #tpu.dot_dimension_numbers<[1], [0], [0], [1], [0, 0, 1, 1], [], []>} : vector<2x64xbf16>, vector<64x64xbf16>, vector<2x64xf32> -> vector<2x64xf32>
    %278 = arith.addf %272, %277 : vector<2x64xf32>
    %279 = vector.extract_strided_slice %253 {offsets = [0, 4, 0], sizes = [2, 1, 64], strides = [1, 1, 1]} : vector<2x16x64xf32> to vector<2x1x64xf32>
    %280 = vector.shape_cast %279 : vector<2x1x64xf32> to vector<2x64xf32>
    %281 = arith.truncf %280 : vector<2x64xf32> to vector<2x64xbf16>
    %c256 = arith.constant 256 : index
    %c0_82 = arith.constant 0 : index
    %282 = vector.load %arg6[%c256, %c0_82] : memref<1024x64xbf16, #tpu.memory_space<vmem>>, vector<64x64xbf16>
    %cst_83 = arith.constant dense<0.000000e+00> : vector<2x64xf32>
    %283 = tpu.matmul %281, %282, %cst_83 {dimension_numbers = #tpu.dot_dimension_numbers<[1], [0], [0], [1], [0, 0, 1, 1], [], []>} : vector<2x64xbf16>, vector<64x64xbf16>, vector<2x64xf32> -> vector<2x64xf32>
    %284 = arith.addf %278, %283 : vector<2x64xf32>
    %285 = vector.extract_strided_slice %253 {offsets = [0, 5, 0], sizes = [2, 1, 64], strides = [1, 1, 1]} : vector<2x16x64xf32> to vector<2x1x64xf32>
    %286 = vector.shape_cast %285 : vector<2x1x64xf32> to vector<2x64xf32>
    %287 = arith.truncf %286 : vector<2x64xf32> to vector<2x64xbf16>
    %c320 = arith.constant 320 : index
    %c0_84 = arith.constant 0 : index
    %288 = vector.load %arg6[%c320, %c0_84] : memref<1024x64xbf16, #tpu.memory_space<vmem>>, vector<64x64xbf16>
    %cst_85 = arith.constant dense<0.000000e+00> : vector<2x64xf32>
    %289 = tpu.matmul %287, %288, %cst_85 {dimension_numbers = #tpu.dot_dimension_numbers<[1], [0], [0], [1], [0, 0, 1, 1], [], []>} : vector<2x64xbf16>, vector<64x64xbf16>, vector<2x64xf32> -> vector<2x64xf32>
    %290 = arith.addf %284, %289 : vector<2x64xf32>
    %291 = vector.extract_strided_slice %253 {offsets = [0, 6, 0], sizes = [2, 1, 64], strides = [1, 1, 1]} : vector<2x16x64xf32> to vector<2x1x64xf32>
    %292 = vector.shape_cast %291 : vector<2x1x64xf32> to vector<2x64xf32>
    %293 = arith.truncf %292 : vector<2x64xf32> to vector<2x64xbf16>
    %c384 = arith.constant 384 : index
    %c0_86 = arith.constant 0 : index
    %294 = vector.load %arg6[%c384, %c0_86] : memref<1024x64xbf16, #tpu.memory_space<vmem>>, vector<64x64xbf16>
    %cst_87 = arith.constant dense<0.000000e+00> : vector<2x64xf32>
    %295 = tpu.matmul %293, %294, %cst_87 {dimension_numbers = #tpu.dot_dimension_numbers<[1], [0], [0], [1], [0, 0, 1, 1], [], []>} : vector<2x64xbf16>, vector<64x64xbf16>, vector<2x64xf32> -> vector<2x64xf32>
    %296 = arith.addf %290, %295 : vector<2x64xf32>
    %297 = vector.extract_strided_slice %253 {offsets = [0, 7, 0], sizes = [2, 1, 64], strides = [1, 1, 1]} : vector<2x16x64xf32> to vector<2x1x64xf32>
    %298 = vector.shape_cast %297 : vector<2x1x64xf32> to vector<2x64xf32>
    %299 = arith.truncf %298 : vector<2x64xf32> to vector<2x64xbf16>
    %c448 = arith.constant 448 : index
    %c0_88 = arith.constant 0 : index
    %300 = vector.load %arg6[%c448, %c0_88] : memref<1024x64xbf16, #tpu.memory_space<vmem>>, vector<64x64xbf16>
    %cst_89 = arith.constant dense<0.000000e+00> : vector<2x64xf32>
    %301 = tpu.matmul %299, %300, %cst_89 {dimension_numbers = #tpu.dot_dimension_numbers<[1], [0], [0], [1], [0, 0, 1, 1], [], []>} : vector<2x64xbf16>, vector<64x64xbf16>, vector<2x64xf32> -> vector<2x64xf32>
    %302 = arith.addf %296, %301 : vector<2x64xf32>
    %303 = vector.extract_strided_slice %253 {offsets = [0, 8, 0], sizes = [2, 1, 64], strides = [1, 1, 1]} : vector<2x16x64xf32> to vector<2x1x64xf32>
    %304 = vector.shape_cast %303 : vector<2x1x64xf32> to vector<2x64xf32>
    %305 = arith.truncf %304 : vector<2x64xf32> to vector<2x64xbf16>
    %c512 = arith.constant 512 : index
    %c0_90 = arith.constant 0 : index
    %306 = vector.load %arg6[%c512, %c0_90] : memref<1024x64xbf16, #tpu.memory_space<vmem>>, vector<64x64xbf16>
    %cst_91 = arith.constant dense<0.000000e+00> : vector<2x64xf32>
    %307 = tpu.matmul %305, %306, %cst_91 {dimension_numbers = #tpu.dot_dimension_numbers<[1], [0], [0], [1], [0, 0, 1, 1], [], []>} : vector<2x64xbf16>, vector<64x64xbf16>, vector<2x64xf32> -> vector<2x64xf32>
    %308 = arith.addf %302, %307 : vector<2x64xf32>
    %309 = vector.extract_strided_slice %253 {offsets = [0, 9, 0], sizes = [2, 1, 64], strides = [1, 1, 1]} : vector<2x16x64xf32> to vector<2x1x64xf32>
    %310 = vector.shape_cast %309 : vector<2x1x64xf32> to vector<2x64xf32>
    %311 = arith.truncf %310 : vector<2x64xf32> to vector<2x64xbf16>
    %c576 = arith.constant 576 : index
    %c0_92 = arith.constant 0 : index
    %312 = vector.load %arg6[%c576, %c0_92] : memref<1024x64xbf16, #tpu.memory_space<vmem>>, vector<64x64xbf16>
    %cst_93 = arith.constant dense<0.000000e+00> : vector<2x64xf32>
    %313 = tpu.matmul %311, %312, %cst_93 {dimension_numbers = #tpu.dot_dimension_numbers<[1], [0], [0], [1], [0, 0, 1, 1], [], []>} : vector<2x64xbf16>, vector<64x64xbf16>, vector<2x64xf32> -> vector<2x64xf32>
    %314 = arith.addf %308, %313 : vector<2x64xf32>
    %315 = vector.extract_strided_slice %253 {offsets = [0, 10, 0], sizes = [2, 1, 64], strides = [1, 1, 1]} : vector<2x16x64xf32> to vector<2x1x64xf32>
    %316 = vector.shape_cast %315 : vector<2x1x64xf32> to vector<2x64xf32>
    %317 = arith.truncf %316 : vector<2x64xf32> to vector<2x64xbf16>
    %c640 = arith.constant 640 : index
    %c0_94 = arith.constant 0 : index
    %318 = vector.load %arg6[%c640, %c0_94] : memref<1024x64xbf16, #tpu.memory_space<vmem>>, vector<64x64xbf16>
    %cst_95 = arith.constant dense<0.000000e+00> : vector<2x64xf32>
    %319 = tpu.matmul %317, %318, %cst_95 {dimension_numbers = #tpu.dot_dimension_numbers<[1], [0], [0], [1], [0, 0, 1, 1], [], []>} : vector<2x64xbf16>, vector<64x64xbf16>, vector<2x64xf32> -> vector<2x64xf32>
    %320 = arith.addf %314, %319 : vector<2x64xf32>
    %321 = vector.extract_strided_slice %253 {offsets = [0, 11, 0], sizes = [2, 1, 64], strides = [1, 1, 1]} : vector<2x16x64xf32> to vector<2x1x64xf32>
    %322 = vector.shape_cast %321 : vector<2x1x64xf32> to vector<2x64xf32>
    %323 = arith.truncf %322 : vector<2x64xf32> to vector<2x64xbf16>
    %c704 = arith.constant 704 : index
    %c0_96 = arith.constant 0 : index
    %324 = vector.load %arg6[%c704, %c0_96] : memref<1024x64xbf16, #tpu.memory_space<vmem>>, vector<64x64xbf16>
    %cst_97 = arith.constant dense<0.000000e+00> : vector<2x64xf32>
    %325 = tpu.matmul %323, %324, %cst_97 {dimension_numbers = #tpu.dot_dimension_numbers<[1], [0], [0], [1], [0, 0, 1, 1], [], []>} : vector<2x64xbf16>, vector<64x64xbf16>, vector<2x64xf32> -> vector<2x64xf32>
    %326 = arith.addf %320, %325 : vector<2x64xf32>
    %327 = vector.extract_strided_slice %253 {offsets = [0, 12, 0], sizes = [2, 1, 64], strides = [1, 1, 1]} : vector<2x16x64xf32> to vector<2x1x64xf32>
    %328 = vector.shape_cast %327 : vector<2x1x64xf32> to vector<2x64xf32>
    %329 = arith.truncf %328 : vector<2x64xf32> to vector<2x64xbf16>
    %c768 = arith.constant 768 : index
    %c0_98 = arith.constant 0 : index
    %330 = vector.load %arg6[%c768, %c0_98] : memref<1024x64xbf16, #tpu.memory_space<vmem>>, vector<64x64xbf16>
    %cst_99 = arith.constant dense<0.000000e+00> : vector<2x64xf32>
    %331 = tpu.matmul %329, %330, %cst_99 {dimension_numbers = #tpu.dot_dimension_numbers<[1], [0], [0], [1], [0, 0, 1, 1], [], []>} : vector<2x64xbf16>, vector<64x64xbf16>, vector<2x64xf32> -> vector<2x64xf32>
    %332 = arith.addf %326, %331 : vector<2x64xf32>
    %333 = vector.extract_strided_slice %253 {offsets = [0, 13, 0], sizes = [2, 1, 64], strides = [1, 1, 1]} : vector<2x16x64xf32> to vector<2x1x64xf32>
    %334 = vector.shape_cast %333 : vector<2x1x64xf32> to vector<2x64xf32>
    %335 = arith.truncf %334 : vector<2x64xf32> to vector<2x64xbf16>
    %c832 = arith.constant 832 : index
    %c0_100 = arith.constant 0 : index
    %336 = vector.load %arg6[%c832, %c0_100] : memref<1024x64xbf16, #tpu.memory_space<vmem>>, vector<64x64xbf16>
    %cst_101 = arith.constant dense<0.000000e+00> : vector<2x64xf32>
    %337 = tpu.matmul %335, %336, %cst_101 {dimension_numbers = #tpu.dot_dimension_numbers<[1], [0], [0], [1], [0, 0, 1, 1], [], []>} : vector<2x64xbf16>, vector<64x64xbf16>, vector<2x64xf32> -> vector<2x64xf32>
    %338 = arith.addf %332, %337 : vector<2x64xf32>
    %339 = vector.extract_strided_slice %253 {offsets = [0, 14, 0], sizes = [2, 1, 64], strides = [1, 1, 1]} : vector<2x16x64xf32> to vector<2x1x64xf32>
    %340 = vector.shape_cast %339 : vector<2x1x64xf32> to vector<2x64xf32>
    %341 = arith.truncf %340 : vector<2x64xf32> to vector<2x64xbf16>
    %c896 = arith.constant 896 : index
    %c0_102 = arith.constant 0 : index
    %342 = vector.load %arg6[%c896, %c0_102] : memref<1024x64xbf16, #tpu.memory_space<vmem>>, vector<64x64xbf16>
    %cst_103 = arith.constant dense<0.000000e+00> : vector<2x64xf32>
    %343 = tpu.matmul %341, %342, %cst_103 {dimension_numbers = #tpu.dot_dimension_numbers<[1], [0], [0], [1], [0, 0, 1, 1], [], []>} : vector<2x64xbf16>, vector<64x64xbf16>, vector<2x64xf32> -> vector<2x64xf32>
    %344 = arith.addf %338, %343 : vector<2x64xf32>
    %345 = vector.extract_strided_slice %253 {offsets = [0, 15, 0], sizes = [2, 1, 64], strides = [1, 1, 1]} : vector<2x16x64xf32> to vector<2x1x64xf32>
    %346 = vector.shape_cast %345 : vector<2x1x64xf32> to vector<2x64xf32>
    %347 = arith.truncf %346 : vector<2x64xf32> to vector<2x64xbf16>
    %c960 = arith.constant 960 : index
    %c0_104 = arith.constant 0 : index
    %348 = vector.load %arg6[%c960, %c0_104] : memref<1024x64xbf16, #tpu.memory_space<vmem>>, vector<64x64xbf16>
    %cst_105 = arith.constant dense<0.000000e+00> : vector<2x64xf32>
    %349 = tpu.matmul %347, %348, %cst_105 {dimension_numbers = #tpu.dot_dimension_numbers<[1], [0], [0], [1], [0, 0, 1, 1], [], []>} : vector<2x64xbf16>, vector<64x64xbf16>, vector<2x64xf32> -> vector<2x64xf32>
    %350 = arith.addf %344, %349 : vector<2x64xf32>
    %c0_106 = arith.constant 0 : index
    %c0_107 = arith.constant 0 : index
    %351 = vector.load %arg7[%c0_106, %c0_107] : memref<1x64xf32, #tpu.memory_space<vmem>>, vector<1x64xf32>
    %352 = vector.broadcast %351 : vector<1x64xf32> to vector<2x64xf32>
    %353 = arith.addf %350, %352 : vector<2x64xf32>
    %cst_108 = arith.constant 0.000000e+00 : f32
    %354 = vector.broadcast %cst_108 : f32 to vector<2x64xf32>
    %355 = arith.cmpf ogt, %353, %354 : vector<2x64xf32>
    %cst_109 = arith.constant 2.000000e-01 : f32
    %356 = vector.broadcast %cst_109 : f32 to vector<2x64xf32>
    %357 = arith.mulf %356, %353 : vector<2x64xf32>
    %358 = arith.select %355, %353, %357 : vector<2x64xi1>, vector<2x64xf32>
    %c0_110 = arith.constant 0 : index
    %c0_111 = arith.constant 0 : index
    %359 = vector.load %arg8[%c0_110, %c0_111] : memref<1x64xf32, #tpu.memory_space<vmem>>, vector<1x64xf32>
    %360 = vector.broadcast %359 : vector<1x64xf32> to vector<2x64xf32>
    %361 = arith.mulf %358, %360 : vector<2x64xf32>
    %cst_112 = arith.constant dense<0.000000e+00> : vector<2xf32>
    %362 = vector.multi_reduction <add>, %361, %cst_112 [1] : vector<2x64xf32> to vector<2xf32>
    %363 = vector.shape_cast %362 : vector<2xf32> to vector<2x1xf32>
    %c0_113 = arith.constant 0 : index
    %c0_114 = arith.constant 0 : index
    %364 = vector.load %arg9[%c0_113, %c0_114] : memref<1x1xf32, #tpu.memory_space<vmem>>, vector<1x1xf32>
    %365 = vector.broadcast %364 : vector<1x1xf32> to vector<2x1xf32>
    %366 = arith.addf %363, %365 : vector<2x1xf32>
    %c0_115 = arith.constant 0 : index
    %c0_116 = arith.constant 0 : index
    %367 = vector.load %arg10[%c0_115, %c0_116] : memref<2x1xf32, #tpu.memory_space<vmem>>, vector<2x1xf32>
    tpu.vector_store %arg10[%c0_115, %c0_116], %366 {strides = array<i32>} : memref<2x1xf32, #tpu.memory_space<vmem>>, vector<2x1xf32>,
    return
  }
  func.func @transform_0(%arg0: i32) -> (i32, i32) {
    %c0_i32 = arith.constant 0 : i32
    %c0_i32_0 = arith.constant 0 : i32
    %c0_i32_1 = arith.constant 0 : i32
    return %c0_i32, %c0_i32_0 : i32, i32
  }
  func.func @transform_1(%arg0: i32) -> (i32, i32) {
    %c0_i32 = arith.constant 0 : i32
    %c0_i32_0 = arith.constant 0 : i32
    %c0_i32_1 = arith.constant 0 : i32
    return %c0_i32, %c0_i32_0 : i32, i32
  }
  func.func @transform_2(%arg0: i32) -> (i32, i32) {
    %c0_i32 = arith.constant 0 : i32
    %c0_i32_0 = arith.constant 0 : i32
    %c0_i32_1 = arith.constant 0 : i32
    return %c0_i32, %c0_i32_0 : i32, i32
  }
  func.func @transform_3(%arg0: i32) -> (i32, i32) {
    %c0_i32 = arith.constant 0 : i32
    %c0_i32_0 = arith.constant 0 : i32
    %c0_i32_1 = arith.constant 0 : i32
    return %c0_i32, %c0_i32_0 : i32, i32
  }
  func.func @transform_4(%arg0: i32) -> (i32, i32) {
    %c0_i32 = arith.constant 0 : i32
    %c0_i32_0 = arith.constant 0 : i32
    %c0_i32_1 = arith.constant 0 : i32
    return %c0_i32, %c0_i32_0 : i32, i32
  }
  func.func @transform_5(%arg0: i32) -> (i32, i32) {
    %c0_i32 = arith.constant 0 : i32
    %c0_i32_0 = arith.constant 0 : i32
    %c0_i32_1 = arith.constant 0 : i32
    return %c0_i32, %c0_i32_0 : i32, i32
  }
  func.func @transform_6(%arg0: i32) -> (i32, i32) {
    %c0_i32 = arith.constant 0 : i32
    %c0_i32_0 = arith.constant 0 : i32
    %c0_i32_1 = arith.constant 0 : i32
    return %c0_i32, %c0_i32_0 : i32, i32
  }
  func.func @transform_7(%arg0: i32) -> (i32, i32) {
    %c0_i32 = arith.constant 0 : i32
    %c0_i32_0 = arith.constant 0 : i32
    %c0_i32_1 = arith.constant 0 : i32
    return %c0_i32, %c0_i32_0 : i32, i32
  }
  func.func @transform_8(%arg0: i32) -> (i32, i32) {
    %c0_i32 = arith.constant 0 : i32
    %c0_i32_0 = arith.constant 0 : i32
    %c0_i32_1 = arith.constant 0 : i32
    return %c0_i32, %c0_i32_0 : i32, i32
  }
  func.func @transform_9(%arg0: i32) -> (i32, i32) {
    %c0_i32 = arith.constant 0 : i32
    %c0_i32_0 = arith.constant 0 : i32
    %c0_i32_1 = arith.constant 0 : i32
    return %c0_i32, %c0_i32_0 : i32, i32
  }
}

</mosaic_0001>

<bundles_post_ra>
// kernel: tpu_custom_call.1
= control target key start
LH: loop header
LB: loop body
LE: loop exit
PB: predicated region body
PF: predicated region fallthrough
CT: control target
= control target key end

     0   :  { %v3400_v0 = vmov 0   ;;  %v35_v39 = vlaneseq  ;;  %v3401_v47 = vmov 0.0   ;;  %s4629_s0 = inlined_call_operand.vmem [shape: f32[32,1], index: 0, kind: input, shape index: {}]   ;;  %s4630_s1 = inlined_call_operand.vmem [shape: f32[1,128], index: 1, kind: input, shape index: {}]   ;;  %s4631_s2 = inlined_call_operand.vmem [shape: f32[1,128], index: 2, kind: input, shape index: {}]   ;;  %s4632_s3 = inlined_call_operand.vmem [shape: bf16[1152,64], index: 3, kind: input, shape index: {}]   ;;  %s4633_s5 = inlined_call_operand.vmem [shape: bf16[1024,64], index: 5, kind: input, shape index: {}]   ;;  %s4634_s4 = inlined_call_operand.vmem [shape: f32[1,64], index: 4, kind: input, shape index: {}]   ;;  %s4635_s8 = inlined_call_operand.<no memory space> [shape: f32[1,1], index: 8, kind: input, shape index: {}]   ;;  %s4636_s6 = inlined_call_operand.vmem [shape: f32[1,64], index: 6, kind: input, shape index: {}]   ;;  %s4637_s7 = inlined_call_operand.vmem [shape: f32[1,64], index: 7, kind: input, shape index: {}]   ;;  %s4638_s9 = inlined_call_operand.vmem [shape: f32[2,1], index: 9, kind: output, shape index: {}]  }
   0x1   :  { %3259 = vset.pattern.permute.xlu1 %v3400_v0  ;;  %3258 = vset.pattern.permute.xlu0 %v3400_v0  ;;  %v62_v1 = vld [vmem:[%s4629_s0 + $0x10] sm:$0xff]  ;;  %v60_v2 = vld [vmem:[%s4629_s0] sm:$0xff]  ;;  %v63_v3 = vld [vmem:[%s4629_s0 + $0x18] sm:$0xff] }
   0x2   :  { %77 = vperm.xlu1 %3259, %v62_v1   ;;  %67 = vperm.xlu0 %3258, %v60_v2   ;;  %v61_v4 = vld [vmem:[%s4629_s0 + $0x8] sm:$0xff]  ;;  %v2645_v5 = vld [vmem:[%s4630_s1] ss:$0 sm:$0xff]  ;;  %v3492_v41 = vand.u32 127, %v35_v39  ;;  %v3268_v0 = vld [vmem:[%s4632_s3 + $0x50] sm:$0xff]  }
   0x3   :  { %v2646_v6 = vld [vmem:[%s4631_s2] ss:$0 sm:$0xff]  ;;  %v3264_v60 = vld [vmem:[%s4632_s3 + $0x48] sm:$0xff]   ;;  %v3269_v1 = vld [vmem:[%s4632_s3 + $0xd0] sm:$0xff]  }
   0x4   :  { %vm37_vm1 = vcmp.lt.s32.totalorder %v3492_v41, 64  ;;  %v3260_v56 = vld [vmem:[%s4632_s3 + $0x40] sm:$0xff]   ;;  %v3265_v61 = vld [vmem:[%s4632_s3 + $0xc8] sm:$0xff]   ;;  %v3270_v2 = vld [vmem:[%s4632_s3 + $0x10] sm:$0xff]  }
   0x5   :  { %v2643_v48 = vsel %vm37_vm1, 1.0, %v3401_v47  ;;  %v3261_v57 = vld [vmem:[%s4632_s3 + $0xc0] sm:$0xff]   ;;  %2839 = vmatprep.subr.bf16.mxu0 %v3260_v56  ;;  %v3266_v62 = vld [vmem:[%s4632_s3 + $0x8] sm:$0xff]  }
   0x6   :  { %82 = vperm.xlu1 %3259, %v63_v3   ;;  %72 = vperm.xlu0 %3258, %v61_v4   ;;  %v3262_v58 = vld [vmem:[%s4632_s3] sm:$0xff]   ;;  %v3267_v63 = vld [vmem:[%s4632_s3 + $0x88] sm:$0xff]   ;;  %v3271_v3 = vld [vmem:[%s4632_s3 + $0x90] sm:$0xff]  }
   0x7   :  { %2867 = vmatprep.subr.bf16.mxu1 %v3261_v57  ;;  %v3263_v59 = vld [vmem:[%s4632_s3 + $0x80] sm:$0xff]   ;;  %2840 = vmatpush3.bf16.msra.mxu0 %v3262_v58  ;;  %v3272_v4 = vld [vmem:[%s4632_s3 + $0x58] sm:$0xff]  }
   0x8   :  { %2868 = vmatpush3.bf16.msra.mxu1 %v3263_v59  ;;  %2841 = vmatprep.subr.bf16.mxu0 %v3264_v60 }
   0x9   :  { %2869 = vmatprep.subr.bf16.mxu1 %v3265_v61 }
   0xb   :  { %2842 = vmatpush3.bf16.msra.mxu0 %v3266_v62 }
   0xc   :  { %2870 = vmatpush3.bf16.msra.mxu1 %v3267_v63  ;;  %2843 = vmatprep.subr.bf16.mxu0 %v3268_v0  ;;  %v4655_v63 = vmov 0  ;;  %v4657_v0 = vmov 0 }
   0xd   :  { %2871 = vmatprep.subr.bf16.mxu1 %v3269_v1 }
   0xf   :  { %2844 = vmatpush3.bf16.msra.mxu0 %v3270_v2 }
  0x10   :  { %2872 = vmatpush3.bf16.msra.mxu1 %v3271_v3  ;;  %2845 = vmatprep.subr.bf16.mxu0 %v3272_v4  ;;  %v4661_v4 = vmov 0 }
  0x81   :  { %v78_v7 = vpop.permute.xlu1 %77  ;;  %v68_v8 = vpop.permute.xlu0 %67 }
  0x82   :  { %v93_v9 = vmul.f32 %v2645_v5, %v78_v7  ;;  %v91_v10 = vmul.f32 %v2645_v5, %v68_v8  ;;  %v3275_v7 = vld [vmem:[%s4632_s3 + $0x98] sm:$0xff]   ;;  %v3276_v8 = vld [vmem:[%s4632_s3 + $0x60] sm:$0xff]  }
  0x84   :  { %v3471_v11 = vadd.f32 %v2646_v6, %v93_v9  ;;  %v3473_v12 = vadd.f32 %v2646_v6, %v91_v10  ;;  %v3277_v9 = vld [vmem:[%s4632_s3 + $0xe0] sm:$0xff]  }
  0x85   :  { %v83_v13 = vpop.permute.xlu1 %82  ;;  %v73_v14 = vpop.permute.xlu0 %72  ;;  %v3278_v10 = vld [vmem:[%s4632_s3 + $0x20] sm:$0xff]  }
  0x86   :  { %v110_v15 = vmul.f32 %v3471_v11, %v3471_v11  ;;  %v106_v16 = vmul.f32 %v3473_v12, %v3473_v12  ;;  %v108_v17 = vadd.f32 %v3471_v11, %v3473_v12  ;;  %v94_v18 = vmul.f32 %v2645_v5, %v83_v13  ;;  %v3279_v13 = vld [vmem:[%s4632_s3 + $0xa0] sm:$0xff]  }
  0x87   :  { %v92_v19 = vmul.f32 %v2645_v5, %v73_v14  ;;  %v3273_v5 = vld [vmem:[%s4632_s3 + $0xd8] sm:$0xff]   ;;  %v3280_v14 = vld [vmem:[%s4632_s3 + $0x68] sm:$0xff]  }
  0x88   :  { %v112_v20 = vadd.f32 %v110_v15, %v106_v16  ;;  %v114_v21 = vmul.f32 0.5, %v108_v17  ;;  %v3481_v22 = vadd.f32 %v2646_v6, %v94_v18  ;;  %2873 = vmatprep.subr.bf16.mxu1 %v3273_v5  ;;  %v3281_v15 = vld [vmem:[%s4632_s3 + $0xe8] sm:$0xff]   ;;  %v3284_v18 = vld [vmem:[%s4632_s3 + $0x70] sm:$0xff]  }
  0x89   :  { %v3483_v23 = vadd.f32 %v2646_v6, %v92_v19  ;;  %v3274_v6 = vld [vmem:[%s4632_s3 + $0x18] sm:$0xff]   ;;  %2874 = vmatpush3.bf16.msra.mxu1 %v3275_v7  ;;  %v3282_v16 = vld [vmem:[%s4632_s3 + $0x28] sm:$0xff]   ;;  %v3285_v19 = vld [vmem:[%s4632_s3 + $0xf0] sm:$0xff]  }
  0x8a   :  { %v116_v24 = vmul.f32 0.5, %v112_v20  ;;  %v118_v25 = vmul.f32 %v114_v21, %v114_v21  ;;  %v111_v26 = vmul.f32 %v3481_v22, %v3481_v22  ;;  %2846 = vmatpush3.bf16.msra.mxu0 %v3274_v6  ;;  %2875 = vmatprep.subr.bf16.mxu1 %v3277_v9  ;;  %v3283_v17 = vld [vmem:[%s4632_s3 + $0xa8] sm:$0xff]   ;;  %v3286_v20 = vld [vmem:[%s4632_s3 + $0x30] sm:$0xff]   ;;  %v4663_v6 = vmov 0 }
  0x8b   :  { %v107_v27 = vmul.f32 %v3483_v23, %v3483_v23  ;;  %v109_v28 = vadd.f32 %v3481_v22, %v3483_v23  ;;  %2847 = vmatprep.subr.bf16.mxu0 %v3276_v8  ;;  %v3287_v21 = vld [vmem:[%s4632_s3 + $0xb0] sm:$0xff]   ;;  %v4667_v9 = vmov 0 }
  0x8c   :  { %v120_v29 = vsub.f32 %v116_v24, %v118_v25  ;;  %v3288_v24 = vld [vmem:[%s4632_s3 + $0x78] sm:$0xff]  }
  0x8d   :  { %v113_v30 = vadd.f32 %v111_v26, %v107_v27  ;;  %v115_v31 = vmul.f32 0.5, %v109_v28  ;;  %2876 = vmatpush3.bf16.msra.mxu1 %v3279_v13  ;;  %v3289_v25 = vld [vmem:[%s4632_s3 + $0xf8] sm:$0xff]   ;;  %v3292_v28 = vld [vmem:[%s4632_s3 + $0x140] sm:$0xff]  }
  0x8e   :  { %v122_v32 = vmax.f32 %v120_v29, 0.0  ;;  %2848 = vmatpush3.bf16.msra.mxu0 %v3278_v10  ;;  %2877 = vmatprep.subr.bf16.mxu1 %v3281_v15  ;;  %v3290_v26 = vld [vmem:[%s4632_s3 + $0x38] sm:$0xff]   ;;  %v3293_v29 = vld [vmem:[%s4632_s3 + $0x1c0] sm:$0xff]   ;;  %v4669_v10 = vmov 0  ;;  %v4671_v15 = vmov 0 }
  0x8f   :  { %v117_v33 = vmul.f32 0.5, %v113_v30  ;;  %v119_v34 = vmul.f32 %v115_v31, %v115_v31  ;;  %2849 = vmatprep.subr.bf16.mxu0 %v3280_v14  ;;  %v3291_v27 = vld [vmem:[%s4632_s3 + $0xb8] sm:$0xff]  }
  0x90   :  { %v124_v35 = vadd.f32 1e-08, %v122_v32 }
  0x91   :  { %v121_v36 = vsub.f32 %v117_v33, %v119_v34  ;;  %2878 = vmatpush3.bf16.msra.mxu1 %v3283_v17 }
  0x92   :  { %3396 = vrsqrt.f32 %v124_v35  ;;  %vm128_vm0 = vcmp.eq.f32.partialorder %v124_v35, inf  ;;  %v131_v45 = vand.u32 2147483648, %v124_v35  ;;  %vm130_vm2 = vcmp.eq.f32.partialorder %v124_v35, 0.0  ;;  %2850 = vmatpush3.bf16.msra.mxu0 %v3282_v16  ;;  %2879 = vmatprep.subr.bf16.mxu1 %v3285_v19  ;;  %v3294_v19 = vld [vmem:[%s4632_s3 + $0x100] sm:$0xff]  }
  0x93   :  { %v123_v37 = vmax.f32 %v121_v36, 0.0  ;;  %2851 = vmatprep.subr.bf16.mxu0 %v3284_v18 }
  0x95   :  { %v125_v38 = vadd.f32 1e-08, %v123_v37  ;;  %2880 = vmatpush3.bf16.msra.mxu1 %v3287_v21  ;;  %v3599_v37 = vshrl.u32 %v35_v39, 7 }
  0x96   :  { %2852 = vmatpush3.bf16.msra.mxu0 %v3286_v20  ;;  %2881 = vmatprep.subr.bf16.mxu1 %v3289_v25 }
  0x97   :  { %3398 = vrsqrt.f32 %v125_v38  ;;  %vm135_vm3 = vcmp.eq.f32.partialorder %v125_v38, inf  ;;  %v138_v50 = vand.u32 2147483648, %v125_v38  ;;  %vm137_vm4 = vcmp.eq.f32.partialorder %v125_v38, 0.0  ;;  %2853 = vmatprep.subr.bf16.mxu0 %v3288_v24 }
  0x99   :  { %2882 = vmatpush3.bf16.msra.mxu1 %v3291_v27 }
  0x9a   :  { %2854 = vmatpush3.bf16.msra.mxu0 %v3290_v26  ;;  %2923 = vmatprep.subr.bf16.mxu1 %v3293_v29 }
  0x9b   :  { %2895 = vmatprep.subr.bf16.mxu0 %v3292_v28 }
  0x9c   :  { %v3397_v40 = vpop.eup %3396 }
  0x9d   :  { %v127_v42 = vmul.f32 %v3397_v40, %v124_v35  ;;  %v48_v40 = vshra.s32 %v3599_v37, 2 }
  0x9f   :  { %v129_v43 = vsel %vm128_vm0, %v124_v35, %v127_v42 }
  0xa0   :  { %v132_v49 = vsel %vm130_vm2, %v131_v45, %v129_v43  ;;  %v52_v43 = vand.u32 3, %v48_v40  ;;  %v47_v45 = vadd.s32 24, %v3599_v37 }
  0xa1   :  { %v3399_v44 = vpop.eup %3398  ;;  %v140_v53 = vmul.f32 %v2643_v48, %v132_v49 }
  0xa2   :  { %v134_v46 = vmul.f32 %v3399_v44, %v125_v38  ;;  %vm309_vm15 = vcmp.ge.s32.totalorder %v52_v43, 0  ;;  %vm313_vm0 = vcmp.le.s32.totalorder %v52_v43, 3  ;;  %v59_v62 = vand.u32 3, %v47_v45 }
  0xa4   :  { %v136_v51 = vsel %vm135_vm3, %v125_v38, %v134_v46  ;;  %v45_v38 = vadd.s32 8, %v3599_v37  ;;  %v56_v46 = vand.u32 3, %v3599_v37  ;;  %v3678_v8 = vadd.s32 1, %v59_v62 }
  0xa5   :  { %v139_v52 = vsel %vm137_vm4, %v138_v50, %v136_v51  ;;  %v168_v50 = vadd.s32 4294967295, %v52_v43  ;;  %v51_v51 = vshra.s32 %v47_v45, 2  ;;  %v3698_v13 = vadd.s32 4294967295, %v59_v62 }
  0xa6   :  { %v141_v54 = vmul.f32 %v2643_v48, %v139_v52  ;;  %v49_v42 = vshra.s32 %v45_v38, 2  ;;  %v3608_v48 = vadd.s32 16, %v3599_v37  ;;  %v57_v49 = vand.u32 3, %v45_v38 }
  0xa7   :  { %v3611_v52 = vadd.s32 1, %v56_v46  ;;  %vm176_vm5 = vcmp.ge.s32.totalorder %v168_v50, 0  ;;  %vm180_vm6 = vcmp.le.s32.totalorder %v168_v50, 3  ;;  %v3616_v56 = vand.u32 3, %v51_v51 }
  0xa8   :  { %v142_v55 = vadd.f32 %v141_v54, %v140_v53  ;;  %v3603_v44 = vand.u32 3, %v49_v42  ;;  %v50_v53 = vshra.s32 %v3608_v48, 2  ;;  %v3614_v54 = vadd.s32 1, %v57_v49  ;;  %vm3618_vm9 = vmand %vm176_vm5, %vm180_vm6 }
  0xa9   :  { %vm4640_vm10 = vcmp.le.s32.totalorder %v3611_v52, 3  ;;  %v3623_v58 = vadd.s32 4294967295, %v56_v46  ;;  %v3632_v61 = vadd.s32 4294967295, %v57_v49  ;;  %v58_v3 = vand.u32 3, %v3608_v48 }
  0xaa   :  { %143 = vadd.xlane.f32.xlu0 %v142_v55  ;;  %v169_v39 = vadd.s32 4294967295, %v3603_v44  ;;  %v396_v55 = vadd.s32 1, %v52_v43  ;;  %v3625_v59 = vand.u32 3, %v50_v53  ;;  %vm4639_vm12 = vcmp.le.s32.totalorder %v3614_v54, 3  ;;  %vm3640_vm3 = vmand %vm3618_vm9, %vm4640_vm10 }
  0xab   :  { %vm310_vm1 = vcmp.ge.s32.totalorder %v3603_v44, 0  ;;  %vm314_vm2 = vcmp.le.s32.totalorder %v3603_v44, 3  ;;  %v4656_v63 = vsel %vm3640_vm3, 4294967295, %v4655_v63  ;;  %vm4645_vm6 = vcmp.ge.s32.totalorder %v3623_v58, 0 }
  0xac   :  { %vm177_vm7 = vcmp.ge.s32.totalorder %v169_v39, 0  ;;  %vm181_vm8 = vcmp.le.s32.totalorder %v169_v39, 3  ;;  %vm400_vm13 = vcmp.ge.s32.totalorder %v396_v55, 0  ;;  %vm404_vm14 = vcmp.le.s32.totalorder %v396_v55, 3 }
  0xad   :  { %vm3627_vm11 = vmand %vm177_vm7, %vm181_vm8  ;;  %v170_v2 = vadd.s32 4294967295, %v3625_v59  ;;  %vm4646_vm7 = vcmp.ge.s32.totalorder %v3632_v61, 0  ;;  %v171_v5 = vadd.s32 4294967295, %v3616_v56  ;;  %vm222_vm10 = vcmp.lt.s32.totalorder %v3599_v37, 4 }
  0xae   :  { %vm3648_vm4 = vmand %vm3627_vm11, %vm4639_vm12  ;;  %vm316_vm3 = vcmp.le.s32.totalorder %v3616_v56, 3  ;;  %v3725_v20 = vadd.s32 1, %v58_v3  ;;  %v2651_v21 = vsel %vm3618_vm9, 1.0, %v3401_v47  ;;  %v2652_v24 = vsel %vm3627_vm11, 1.0, %v3401_v47 }
  0xaf   :  { %v4658_v0 = vsel %vm3648_vm4, 4294967295, %v4657_v0  ;;  %vm3652_vm5 = vmand %vm400_vm13, %vm404_vm14  ;;  %vm40_vm13 = vcmp.eq.s32.totalorder %v3492_v41, 64  ;;  %v3688_v41 = vadd.s32 4294967295, %v58_v3  ;;  %vm315_vm4 = vcmp.le.s32.totalorder %v3625_v59, 3 }
  0xb0   :  { %vm3660_vm8 = vmand %vm309_vm15, %vm313_vm0  ;;  %vm178_vm0 = vcmp.ge.s32.totalorder %v170_v2, 0  ;;  %v2644_v14 = vsel %vm40_vm13, 1.0, %v3401_v47  ;;  %vm312_vm13 = vcmp.ge.s32.totalorder %v3616_v56, 0  ;;  %v3734_v25 = vadd.s32 1, %v3603_v44 }
  0xb1   :  { %v4662_v4 = vsel %vm3660_vm8, 4294967295, %v4661_v4  ;;  %vm3665_vm12 = vmand %vm310_vm1, %vm314_vm2  ;;  %vm182_vm1 = vcmp.le.s32.totalorder %v170_v2, 3  ;;  %v3748_v28 = vsel %vm3652_vm5, 1.0, %v3401_v47 }
  0xb2   :  { %v4664_v6 = vsel %vm3665_vm12, 4294967295, %v4663_v6  ;;  %vm3674_vm14 = vmand %vm3660_vm8, %vm4645_vm6  ;;  %vm183_vm8 = vcmp.le.s32.totalorder %v171_v5, 3 }
  0xb3   :  { %vm3684_vm15 = vmand %vm3665_vm12, %vm4646_vm7 }
  0xb4   :  { %v4668_v9 = vsel %vm3684_vm15, 4294967295, %v4667_v9  ;;  %vm3694_vm2 = vmand %vm3618_vm9, %vm4645_vm6  ;;  %vm4675_vm15 = vcmp.ge.s32.totalorder %v171_v5, 0  ;;  %vm4648_vm6 = vcmp.ge.s32.totalorder %v3688_v41, 0  ;;  %vm304_vm9 = vcmp.lt.s32.totalorder %v3599_v37, 1 }
  0xb5   :  { %v4670_v10 = vsel %vm3694_vm2, 4294967295, %v4669_v10  ;;  %vm3705_vm12 = vmand %vm3627_vm11, %vm4646_vm7  ;;  %vm4685_vm7 = vnez %v4658_v0 }
  0xb6   :  { %v4672_v15 = vsel %vm3705_vm12, 4294967295, %v4671_v15  ;;  %vm3712_vm2 = vmand %vm178_vm0, %vm182_vm1  ;;  %vm4690_vm11 = vnez %v4670_v10 }
  0xb7   :  { %vm3720_vm12 = vmand %vm4675_vm15, %vm183_vm8  ;;  %vm4647_vm8 = vcmp.ge.s32.totalorder %v3698_v13, 0  ;;  %vm4678_vm15 = vcmp.ge.s32.totalorder %v3625_v59, 0 }
  0xb8   :  { %vm3741_vm0 = vmand %vm4678_vm15, %vm315_vm4  ;;  %vm4683_vm4 = vnez %v4668_v9  ;;  %vm4684_vm15 = vnez %v4656_v63  ;;  %v2654_v42 = vsel %vm3720_vm12, 1.0, %v3401_v47 }
  0xb9   :  { %vm3756_vm1 = vmand %vm312_vm13, %vm316_vm3  ;;  %vm4650_vm13 = vcmp.le.s32.totalorder %v3725_v20, 3 }
  0xba   :  { %vm3780_vm3 = vmand %vm3741_vm0, %vm4648_vm6  ;;  %v2666_v1 = vsel %vm3756_vm1, 1.0, %v3401_v47 }
  0xbb   :  { %v2661_v39 = vsel %vm3780_vm3, 1.0, %v3401_v47  ;;  %vm284_vm3 = vmand %vm3712_vm2, %vm4650_vm13 }
 0x137   :  { %v144_v30 = vpop.xlane.xlu0 %143 }
 0x138   :  { %v145_v31 = vrot.slane %v144_v30, 4 }
 0x13a   :  { %v146_v32 = vadd.f32 %v145_v31, %v144_v30  ;;  %v2659_v30 = vsel %vm3674_vm14, 1.0, %v3401_v47  ;;  %v2660_v31 = vsel %vm4683_vm4, 1.0, %v3401_v47  ;;  %vm3798_vm14 = vmand %vm3756_vm1, %vm4647_vm8 }
 0x13b   :  { %vm3823_vm4 = vmand %vm3712_vm2, %vm4648_vm6  ;;  %v2662_v51 = vsel %vm3798_vm14, 1.0, %v3401_v47  ;;  %vm4722_vm6 = vcmp.ge.s32.totalorder %v3632_v61, 0  ;;  %v3319_v61 = vld [vmem:[%s4632_s3 + $0x1b0] sm:$0xff]  }
 0x13c   :  { %v147_v33 = vrot.slane %v146_v32, 2  ;;  %v2649_v0 = vsel %vm3823_vm4, 1.0, %v3401_v47 }
 0x13e   :  { %v148_v34 = vadd.f32 %v147_v33, %v146_v32  ;;  %v3769_v32 = vsel %vm4684_vm15, 1.0, %v3401_v47  ;;  %v3774_v33 = vsel %vm4685_vm7, 1.0, %v3401_v47  ;;  %vm405_vm15 = vcmp.le.s32.totalorder %v3734_v25, 3 }
 0x13f   :  { %vm4691_vm7 = vnez %v4672_v15 }
 0x140   :  { %v149_v35 = vrot.slane %v148_v34, 1 }
 0x142   :  { %v150_v36 = vadd.f32 %v149_v35, %v148_v34 }
 0x144   :  { %3253 = vpush %v150_v36 }
 0x175   :  { %s3254_s17 = spop %3253 }
 0x176   :  { %v152_v16 = vstv %s3254_s17 }
 0x177   :  { %v153_v18 = vmul.f32 0.0009765625, %v152_v16 }
 0x179   :  { %v154_v27 = vmul.f32 %v2644_v14, %v153_v18 }
 0x17b   :  { %v3785_v35 = vadd.f32 %v154_v27, %v3473_v12  ;;  %v3788_v36 = vadd.f32 %v154_v27, %v3483_v23  ;;  %v3791_v38 = vadd.f32 %v154_v27, %v3481_v22  ;;  %v2647_v12 = vsel %vm4690_vm11, 1.0, %v3401_v47  ;;  %vm195_vm11 = vmand %vm3720_vm12, %vm4647_vm8 }
 0x17c   :  { %v2648_v22 = vsel %vm4691_vm7, 1.0, %v3401_v47  ;;  %v3814_v23 = vsel %vm3712_vm2, 1.0, %v3401_v47  ;;  %v2650_v2 = vsel %vm195_vm11, 1.0, %v3401_v47  ;;  %v3864_v3 = vadd.f32 %v154_v27, %v3471_v11 }
 0x17d   :  { %v218_v44 = vrot.slane %v3785_v35, 4  ;;  %v219_v45 = vrot.slane %v3788_v36, 4  ;;  %v221_v46 = vrot.slane %v3791_v38, 4  ;;  %v300_v48 = vrot.slane %v3785_v35, 7 }
 0x17e   :  { %v301_v49 = vrot.slane %v3788_v36, 7  ;;  %v303_v50 = vrot.slane %v3791_v38, 7  ;;  %v159_v57 = vrot.slane %v3785_v35, 3  ;;  %v160_v60 = vrot.slane %v3788_v36, 3 }
 0x17f   :  { %v3845_v53 = vsel %vm222_vm10, %v218_v44, %v219_v45  ;;  %v3849_v55 = vsel %vm222_vm10, %v221_v46, %v218_v44  ;;  %v162_v9 = vrot.slane %v3791_v38, 3  ;;  %vm4694_vm7 = vcmp.lt.s32.totalorder %v3599_v37, 5 }
 0x180   :  { %v251_v62 = vmul.f32 %v2651_v21, %v3849_v55  ;;  %v252_v63 = vmul.f32 %v2652_v24, %v3845_v53  ;;  %v307_v5 = vsel %vm304_vm9, %v300_v48, %v301_v49  ;;  %v308_v7 = vsel %vm304_vm9, %v303_v50, %v300_v48  ;;  %vm4696_vm4 = vmmov %vm4694_vm7 }
 0x181   :  { %v337_v14 = vmul.f32 %v2659_v30, %v308_v7  ;;  %v338_v15 = vmul.f32 %v2660_v31, %v307_v5  ;;  %v3873_v16 = vsel %vm4694_vm7, %v159_v57, %v160_v60  ;;  %vm4695_vm2 = vcmp.le.s32.totalorder %v3678_v8, 3 }
 0x182   :  { %v255_v10 = vpack.c.bf16 %v252_v63, %v251_v62  ;;  %vm285_vm14 = vmand %vm3720_vm12, %vm4695_vm2  ;;  %v3881_v11 = vsel %vm4696_vm4, %v162_v9, %v159_v57  ;;  %v213_v17 = vmul.f32 %v2648_v22, %v3873_v16  ;;  %v257_v18 = vrot.slane %v3785_v35, 5  ;;  %v3296_v57 = vld [vmem:[%s4632_s3 + $0x148] sm:$0xff]  }
 0x183   :  { %v2657_v21 = vsel %vm284_vm3, 1.0, %v3401_v47  ;;  %v341_v24 = vpack.c.bf16 %v338_v15, %v337_v14  ;;  %v212_v27 = vmul.f32 %v2647_v12, %v3881_v11  ;;  %v258_v30 = vrot.slane %v3788_v36, 5 }
 0x184   :  { %1093 = vmatprep.mubr.bf16.mxu0 %v255_v10  ;;  %v260_v31 = vrot.slane %v3791_v38, 5  ;;  %v220_v34 = vrot.slane %v3864_v3, 4  ;;  %v302_v40 = vrot.slane %v3864_v3, 7  ;;  %v161_v22 = vrot.slane %v3864_v3, 3 }
 0x185   :  { %v2658_v43 = vsel %vm285_vm14, 1.0, %v3401_v47  ;;  %1142 = vmatprep.mubr.bf16.mxu1 %v341_v24  ;;  %v216_v44 = vpack.c.bf16 %v213_v17, %v212_v27  ;;  %vm4697_vm12 = vcmp.lt.s32.totalorder %v3599_v37, 3  ;;  %v259_v62 = vrot.slane %v3864_v3, 5  ;;  %v3298_v27 = vld [vmem:[%s4632_s3 + $0x108] sm:$0xff]  }
 0x186   :  { %v3898_v12 = vsel %vm4697_vm12, %v257_v18, %v258_v30  ;;  %vm4698_vm11 = vmmov %vm4697_vm12  ;;  %vm4699_vm3 = vcmp.ge.s32.totalorder %v3734_v25, 0  ;;  %v3922_v10 = vsel %vm222_vm10, %v220_v34, %v221_v46  ;;  %v365_v14 = vrot.slane %v3785_v35, 1  ;;  %v3295_v25 = vld [vmem:[%s4632_s3 + $0x180] sm:$0xff]   ;;  %v3304_v46 = vld [vmem:[%s4632_s3 + $0x158] sm:$0xff]  }
 0x187   :  { %v3902_v48 = vsel %vm4698_vm11, %v260_v31, %v257_v18  ;;  %vm3912_vm7 = vmand %vm4699_vm3, %vm405_vm15  ;;  %v295_v7 = vmul.f32 %v3774_v33, %v3898_v12  ;;  %1094 = vmatmul.mubr.bf16.vlgmr.msra.gmra.mrb[0].mxu0 %v216_v44  ;;  %v224_v15 = vsel %vm222_vm10, %v219_v45, %v220_v34  ;;  %v254_v17 = vmul.f32 %v2654_v42, %v3922_v10 }
 0x188   :  { %v294_v5 = vmul.f32 %v3769_v32, %v3902_v48  ;;  %v305_v32 = vsel %vm304_vm9, %v302_v40, %v303_v50  ;;  %v306_v33 = vsel %vm304_vm9, %v301_v49, %v302_v40  ;;  %vm4702_vm15 = vcmp.le.s32.totalorder %v3611_v52, 3  ;;  %2896 = vmatpush3.bf16.msra.mxu0 %v3294_v19  ;;  %v3297_v50 = vld [vmem:[%s4632_s3 + $0x1c8] sm:$0xff]  }
 0x189   :  { %vm4703_vm2 = vnez %v4662_v4  ;;  %v253_v45 = vmul.f32 %v3814_v23, %v224_v15  ;;  %v339_v24 = vmul.f32 %v2661_v39, %v306_v33  ;;  %v340_v42 = vmul.f32 %v2662_v51, %v305_v32  ;;  %2897 = vmatprep.subr.bf16.mxu0 %v3296_v57 }
 0x18a   :  { %vm3939_vm14 = vmand %vm4703_vm2, %vm4702_vm15  ;;  %v298_v18 = vpack.c.bf16 %v295_v7, %v294_v5  ;;  %vm4706_vm10 = vcmp.le.s32.totalorder %v3614_v54, 3  ;;  %vm4707_vm4 = vnez %v4664_v6  ;;  %vm4710_vm9 = vcmp.lt.s32.totalorder %v3599_v37, 5 }
 0x18b   :  { %vm3948_vm12 = vmand %vm4707_vm4, %vm4706_vm10  ;;  %v3960_v23 = vsel %vm4710_vm9, %v161_v22, %v162_v9  ;;  %vm4712_vm3 = vcmp.lt.s32.totalorder %v3599_v37, 3  ;;  %v256_v34 = vpack.c.bf16 %v254_v17, %v253_v45  ;;  %v342_v40 = vpack.c.bf16 %v340_v42, %v339_v24  ;;  %v3300_v9 = vld [vmem:[%s4632_s3 + $0x150] sm:$0xff]   ;;  %v3305_v24 = vld [vmem:[%s4632_s3 + $0x1d8] sm:$0xff]  }
 0x18c   :  { %vm4711_vm11 = vmmov %vm4710_vm9  ;;  %v3968_v51 = vsel %vm4712_vm3, %v259_v62, %v260_v31  ;;  %1143 = vmatmul.mubr.bf16.vlgmr.msra.gmra.mrb[0].mxu1 %v298_v18  ;;  %v3299_v31 = vld [vmem:[%s4632_s3 + $0x188] sm:$0xff]   ;;  %vm4649_vm10 = vcmp.lt.s32.totalorder %v3599_v37, 7  ;;  %v366_v5 = vrot.slane %v3788_v36, 1  ;;  %v367_v7 = vrot.slane %v3864_v3, 1  ;;  %2898 = vmatpush3.bf16.msra.mxu0 %v3298_v27  ;;  %v3302_v17 = vld [vmem:[%s4632_s3 + $0x110] sm:$0xff]  }
 0x18d   :  { %v3964_v39 = vsel %vm4711_vm11, %v160_v60, %v161_v22  ;;  %vm4713_vm15 = vmmov %vm4712_vm3  ;;  %v215_v60 = vmul.f32 %v2650_v2, %v3960_v23  ;;  %2924 = vmatpush3.bf16.msra.mxu1 %v3295_v25  ;;  %v2668_v22 = vsel %vm3948_vm12, 1.0, %v3401_v47  ;;  %1101 = vmatprep.mubr.bf16.mxu0 %v256_v34  ;;  %v3301_v2 = vld [vmem:[%s4632_s3 + $0x1d0] sm:$0xff]   ;;  %v450_v32 = vmul.f32 %v3748_v28, %v3845_v53  ;;  %v3306_v42 = vld [vmem:[%s4632_s3 + $0x118] sm:$0xff]  }
 0x18e   :  { %v3972_v19 = vsel %vm4713_vm15, %v258_v30, %v259_v62  ;;  %v214_v44 = vmul.f32 %v2649_v0, %v3964_v39  ;;  %v2667_v30 = vsel %vm3939_vm14, 1.0, %v3401_v47  ;;  %v2676_v0 = vsel %vm3912_vm7, 1.0, %v3401_v47  ;;  %1150 = vmatprep.mubr.bf16.mxu1 %v342_v40  ;;  %2925 = vmatprep.subr.bf16.mxu1 %v3297_v50  ;;  %v3303_v28 = vld [vmem:[%s4632_s3 + $0x190] sm:$0xff]   ;;  %v3308_v50 = vld [vmem:[%s4632_s3 + $0x160] sm:$0xff]   ;;  %v3307_v34 = vld [vmem:[%s4632_s3 + $0x198] sm:$0xff]  }
 0x18f   :  { %v296_v57 = vmul.f32 %v2657_v21, %v3972_v19  ;;  %v297_v62 = vmul.f32 %v2658_v43, %v3968_v51  ;;  %2899 = vmatprep.subr.bf16.mxu0 %v3300_v9  ;;  %v371_v21 = vsel %vm4649_vm10, %v366_v5, %v367_v7  ;;  %v372_v43 = vsel %vm4649_vm10, %v365_v14, %v366_v5  ;;  %v3309_v40 = vld [vmem:[%s4632_s3 + $0x1e0] sm:$0xff]   ;;  %v3318_v5 = vld [vmem:[%s4632_s3 + $0x130] sm:$0xff]   ;;  %vm413_vm10 = vmand %vm3912_vm7, %vm4722_vm6 }
 0x190   :  { %v217_v25 = vpack.c.bf16 %v215_v60, %v214_v44  ;;  %v451_v33 = vmul.f32 %v2676_v0, %v224_v15  ;;  %v390_v53 = vmul.f32 %v2667_v30, %v372_v43  ;;  %v391_v18 = vmul.f32 %v2668_v22, %v371_v21  ;;  %2900 = vmatpush3.bf16.msra.mxu0 %v3302_v17  ;;  %v3310_v9 = vld [vmem:[%s4632_s3 + $0x120] sm:$0xff]   ;;  %v3314_v30 = vld [vmem:[%s4632_s3 + $0x128] sm:$0xff]   ;;  %v3316_v0 = vld [vmem:[%s4632_s3 + $0x170] sm:$0xff]  }
 0x191   :  { %2926 = vmatpush3.bf16.msra.mxu1 %v3299_v31  ;;  %v299_v45 = vpack.c.bf16 %v297_v62, %v296_v57  ;;  %2901 = vmatprep.subr.bf16.mxu0 %v3304_v46  ;;  %v399_v27 = vadd.s32 1, %v3616_v56  ;;  %v3312_v56 = vld [vmem:[%s4632_s3 + $0x168] sm:$0xff]   ;;  %v3311_v44 = vld [vmem:[%s4632_s3 + $0x1a0] sm:$0xff]   ;;  %v398_v60 = vadd.s32 1, %v3625_v59  ;;  %vm4716_vm11 = vcmp.ge.s32.totalorder %v3623_v58, 0  ;;  %v3317_v57 = vld [vmem:[%s4632_s3 + $0x1f0] sm:$0xff]  }
 0x192   :  { %1102 = vmatmul.mubr.bf16.gmra.mrb[4].mxu0 %v217_v25  ;;  %2927 = vmatprep.subr.bf16.mxu1 %v3301_v2  ;;  %v394_v15 = vpack.c.bf16 %v391_v18, %v390_v53  ;;  %v454_v49 = vpack.c.bf16 %v451_v33, %v450_v32  ;;  %v3313_v31 = vld [vmem:[%s4632_s3 + $0x1e8] sm:$0xff]   ;;  %vm4061_vm3 = vmand %vm3652_vm5, %vm4716_vm11  ;;  %v368_v58 = vrot.slane %v3791_v38, 1  ;;  %vm4721_vm11 = vcmp.le.s32.totalorder %v3678_v8, 3  ;;  %v3320_v25 = vld [vmem:[%s4632_s3 + $0x178] sm:$0xff]  }
 0x193   :  { %vm403_vm14 = vcmp.ge.s32.totalorder %v399_v27, 0  ;;  %vm407_vm12 = vcmp.le.s32.totalorder %v399_v27, 3  ;;  %v3315_v2 = vld [vmem:[%s4632_s3 + $0x1a8] sm:$0xff]   ;;  %vm402_vm15 = vcmp.ge.s32.totalorder %v398_v60, 0  ;;  %vm381_vm8 = vmand %vm3756_vm1, %vm4721_vm11  ;;  %v2663_v17 = vsel %vm4703_vm2, 1.0, %v3401_v47  ;;  %v3321_v43 = vld [vmem:[%s4632_s3 + $0x1f8] sm:$0xff]  }
 0x194   :  { %1151 = vmatmul.mubr.bf16.gmra.mrb[4].mxu1 %v299_v45  ;;  %1191 = vmatprep.mubr.bf16.mxu0 %v394_v15  ;;  %vm4050_vm9 = vmand %vm403_vm14, %vm407_vm12  ;;  %vm406_vm14 = vcmp.le.s32.totalorder %v398_v60, 3  ;;  %v2664_v32 = vsel %vm4707_vm4, 1.0, %v3401_v47  ;;  %vm4725_vm6 = vcmp.lt.s32.totalorder %v3599_v37, 7  ;;  %v2670_v46 = vsel %vm381_vm8, 1.0, %v3401_v47  ;;  %v3324_v45 = vld [vmem:[%s4632_s3 + $0x200] sm:$0xff]   ;;  %v3323_v15 = vld [vmem:[%s4632_s3 + $0x1b8] sm:$0xff]  }
 0x195   :  { %2928 = vmatpush3.bf16.msra.mxu1 %v3303_v28  ;;  %1240 = vmatprep.mubr.bf16.mxu1 %v454_v49  ;;  %vm4076_vm12 = vmand %vm3741_vm0, %vm4650_vm13  ;;  %v370_v4 = vsel %vm4725_vm6, %v367_v7, %v368_v58  ;;  %v2671_v28 = vsel %vm4061_vm3, 1.0, %v3401_v47  ;;  %v2672_v53 = vsel %vm413_vm10, 1.0, %v3401_v47  ;;  %v3322_v7 = vld [vmem:[%s4632_s3 + $0x138] sm:$0xff]   ;;  %v2678_v37 = vsel %vm4050_vm9, 1.0, %v3401_v47  ;;  %v3336_v62 = vld [vmem:[%s4633_s5 + $0x30] sm:$0xff]  }
 0x196   :  { %2929 = vmatprep.subr.bf16.mxu1 %v3305_v24  ;;  %2902 = vmatpush3.bf16.msra.mxu0 %v3306_v42  ;;  %vm4100_vm13 = vmand %vm402_vm15, %vm406_vm14  ;;  %v2669_v33 = vsel %vm4076_vm12, 1.0, %v3401_v47  ;;  %v360_v18 = vmul.f32 %v2664_v32, %v3788_v36  ;;  %vm4727_vm8 = vcmp.ge.s32.totalorder %v3688_v41, 0  ;;  %v428_v36 = vmul.f32 %v2671_v28, %v3873_v16  ;;  %v3325_v16 = vld [vmem:[%s4632_s3 + $0x208] sm:$0xff]   ;;  %v2683_v21 = vld [vmem:[%s4634_s4] ss:$0 sm:$0xff] }
 0x197   :  { %2903 = vmatprep.subr.bf16.mxu0 %v3308_v50  ;;  %vm4726_vm2 = vmmov %vm4725_vm6  ;;  %v2677_v24 = vsel %vm4100_vm13, 1.0, %v3401_v47  ;;  %v392_v42 = vmul.f32 %v2669_v33, %v370_v4  ;;  %v429_v50 = vmul.f32 %v2672_v53, %v3964_v39  ;;  %vm4730_vm10 = vcmp.le.s32.totalorder %v3611_v52, 3 }
 0x198   :  { %v373_v6 = vsel %vm4726_vm2, %v368_v58, %v365_v14  ;;  %v359_v14 = vmul.f32 %v2663_v17, %v3785_v35  ;;  %vm4147_vm4 = vmand %vm4100_vm13, %vm4727_vm8  ;;  %v453_v27 = vmul.f32 %v2678_v37, %v3849_v55  ;;  %v452_v41 = vmul.f32 %v2677_v24, %v3922_v10  ;;  %v3333_v58 = vld [vmem:[%s4633_s5 + $0x40] sm:$0xff]   ;;  %v3339_v17 = vld [vmem:[%s4633_s5 + $0x58] sm:$0xff]  }
 0x199   :  { %2930 = vmatpush3.bf16.msra.mxu1 %v3307_v34  ;;  %v393_v49 = vmul.f32 %v2670_v46, %v373_v6  ;;  %vm460_vm3 = vmand %vm3652_vm5, %vm4730_vm10  ;;  %vm4731_vm15 = vcmp.le.s32.totalorder %v3614_v54, 3  ;;  %vm4732_vm12 = vcmp.ge.s32.totalorder %v3698_v13, 0  ;;  %v2665_v54 = vsel %vm3741_vm0, 1.0, %v3401_v47 }
 0x19a   :  { %2931 = vmatprep.subr.bf16.mxu1 %v3309_v40  ;;  %2904 = vmatpush3.bf16.msra.mxu0 %v3310_v9  ;;  %vm461_vm14 = vmand %vm3912_vm7, %vm4731_vm15  ;;  %v363_v34 = vpack.c.bf16 %v360_v18, %v359_v14  ;;  %v432_v55 = vpack.c.bf16 %v429_v50, %v428_v36  ;;  %v2679_v63 = vsel %vm460_vm3, 1.0, %v3401_v47  ;;  %v455_v13 = vpack.c.bf16 %v453_v27, %v452_v41  ;;  %v3326_v9 = vld [vmem:[%s4632_s3 + $0x210] sm:$0xff]  }
 0x19b   :  { %2905 = vmatprep.subr.bf16.mxu0 %v3312_v56  ;;  %vm415_vm5 = vmand %vm4050_vm9, %vm4732_vm12  ;;  %v395_v52 = vpack.c.bf16 %v393_v49, %v392_v42  ;;  %v2680_v10 = vsel %vm461_vm14, 1.0, %v3401_v47  ;;  %v2673_v26 = vsel %vm4147_vm4, 1.0, %v3401_v47  ;;  %v361_v29 = vmul.f32 %v2665_v54, %v3864_v3 }
 0x19c   :  { %v2674_v39 = vsel %vm415_vm5, 1.0, %v3401_v47  ;;  %v362_v40 = vmul.f32 %v2666_v1, %v3791_v38  ;;  %v472_v56 = vmul.f32 %v2679_v63, %v3898_v12  ;;  %v430_v60 = vmul.f32 %v2673_v26, %v3960_v23  ;;  %v3327_v38 = vld [vmem:[%s4632_s3 + $0x218] sm:$0xff]   ;;  %v3328_v12 = vld [vmem:[%s4632_s3 + $0x220] sm:$0xff]   ;;  %v3330_v23 = vld [vmem:[%s4632_s3 + $0x230] sm:$0xff]  }
 0x19d   :  { %2932 = vmatpush3.bf16.msra.mxu1 %v3311_v44  ;;  %v473_v44 = vmul.f32 %v2680_v10, %v3972_v19  ;;  %vm4733_vm0 = vmmov %vm4721_vm11  ;;  %vm4734_vm7 = vcmp.le.s32.totalorder %v3725_v20, 3  ;;  %v3331_v19 = vld [vmem:[%s4632_s3 + $0x238] sm:$0xff]   ;;  %vm1341_vm4 = vcmask 1041409   ;;  %vm1368_vm10 = vcmask 523264  }
 0x19e   :  { %2933 = vmatprep.subr.bf16.mxu1 %v3313_v31  ;;  %2906 = vmatpush3.bf16.msra.mxu0 %v3314_v30  ;;  %v431_v31 = vmul.f32 %v2674_v39, %v3881_v11  ;;  %v364_v30 = vpack.c.bf16 %v362_v40, %v361_v29  ;;  %v3329_v11 = vld [vmem:[%s4632_s3 + $0x228] sm:$0xff]   ;;  %vm463_vm1 = vmand %vm4050_vm9, %vm4733_vm0  ;;  %vm2625_vm15 = vcmask 517120   ;;  %vm2637_vm14 = vcmask 1024  }
 0x19f   :  { %2907 = vmatprep.subr.bf16.mxu0 %v3316_v0  ;;  %v476_v3 = vpack.c.bf16 %v473_v44, %v472_v56  ;;  %vm462_vm11 = vmand %vm4100_vm13, %vm4734_vm7  ;;  %v2682_v59 = vsel %vm463_vm1, 1.0, %v3401_v47  ;;  %vm3402_vm13 = vmmov 0  }
 0x1a0   :  { %v433_v0 = vpack.c.bf16 %v431_v31, %v430_v60  ;;  %v475_v8 = vmul.f32 %v2682_v59, %v3902_v48  ;;  %v3334_v48 = vld [vmem:[%s4633_s5 + $0x28] sm:$0xff]  }
 0x1a1   :  { %2934 = vmatpush3.bf16.msra.mxu1 %v3315_v2  ;;  %v2681_v2 = vsel %vm462_vm11, 1.0, %v3401_v47 }
 0x1a2   :  { %2935 = vmatprep.subr.bf16.mxu1 %v3317_v57  ;;  %2908 = vmatpush3.bf16.msra.mxu0 %v3318_v5  ;;  %v474_v22 = vmul.f32 %v2681_v2, %v3968_v51  ;;  %v3332_v57 = vld [vmem:[%s4633_s5 + $0x20] sm:$0xff]   ;;  %v3335_v51 = vld [vmem:[%s4633_s5 + $0x48] sm:$0xff]   ;;  %v3337_v5 = vld [vmem:[%s4633_s5 + $0x50] sm:$0xff]  }
 0x1a3   :  { %2909 = vmatprep.subr.bf16.mxu0 %v3320_v25  ;;  %v3338_v25 = vld [vmem:[%s4633_s5 + $0x38] sm:$0xff]  }
 0x1a4   :  { %v477_v20 = vpack.c.bf16 %v475_v8, %v474_v22 }
 0x1a5   :  { %2936 = vmatpush3.bf16.msra.mxu1 %v3319_v61 }
 0x1a6   :  { %2937 = vmatprep.subr.bf16.mxu1 %v3321_v43  ;;  %2910 = vmatpush3.bf16.msra.mxu0 %v3322_v7 }
 0x1a7   :  { %3041 = vmatprep.subr.bf16.mxu0 %v3324_v45 }
 0x1a9   :  { %2938 = vmatpush3.bf16.msra.mxu1 %v3323_v15  ;;  %1192 = vmatmul.mubr.bf16.vlgmr.msra.gmra.mrb[8].mxu0 %v363_v34 }
 0x1aa   :  { %3061 = vmatprep.subr.bf16.mxu1 %v3401_v47  ;;  %1199 = vmatprep.mubr.bf16.mxu0 %v395_v52 }
 0x1ab   :  { %3042 = vmatpush3.bf16.msra.mxu0 %v3324_v45 }
 0x1ac   :  { %1241 = vmatmul.mubr.bf16.vlgmr.msra.gmra.mrb[8].mxu1 %v432_v55  ;;  %3043 = vmatprep.subr.bf16.mxu0 %v3325_v16 }
 0x1ad   :  { %1248 = vmatprep.mubr.bf16.mxu1 %v455_v13  ;;  %3062 = vmatpush3.bf16.msra.mxu1 %v3332_v57 }
 0x1ae   :  { %3063 = vmatprep.subr.bf16.mxu1 %v3401_v47 }
 0x1af   :  { %3044 = vmatpush3.bf16.msra.mxu0 %v3325_v16 }
 0x1b0   :  { %3045 = vmatprep.subr.bf16.mxu0 %v3326_v9 }
 0x1b1   :  { %1200 = vmatmul.mubr.bf16.gmra.mrb[12].mxu0 %v364_v30  ;;  %3064 = vmatpush3.bf16.msra.mxu1 %v3334_v48 }
 0x1b2   :  { %3057 = vmatprep.mubr.bf16.mxu0 %v476_v3  ;;  %3065 = vmatprep.subr.bf16.mxu1 %v3401_v47 }
 0x1b3   :  { %3046 = vmatpush3.bf16.msra.mxu0 %v3326_v9 }
 0x1b4   :  { %1249 = vmatmul.mubr.bf16.gmra.mrb[12].mxu1 %v433_v0  ;;  %3047 = vmatprep.subr.bf16.mxu0 %v3327_v38 }
 0x1b5   :  { %3069 = vmatprep.mubr.msk.bf16.mxu1 %vm3402_vm13, %v3401_v47  ;;  %3066 = vmatpush3.bf16.msra.mxu1 %v3336_v62 }
 0x1b6   :  { %3067 = vmatprep.subr.bf16.mxu1 %v3401_v47 }
 0x1b7   :  { %3048 = vmatpush3.bf16.msra.mxu0 %v3327_v38 }
 0x1b8   :  { %3049 = vmatprep.subr.bf16.mxu0 %v3328_v12 }
 0x1b9   :  { %3068 = vmatpush3.bf16.msra.mxu1 %v3338_v25 }
 0x1ba   :  { %3073 = vmatprep.subr.bf16.mxu1 %v3401_v47 }
 0x1bb   :  { %3050 = vmatpush3.bf16.msra.mxu0 %v3328_v12 }
 0x1bc   :  { %3051 = vmatprep.subr.bf16.mxu0 %v3329_v11 }
 0x1bf   :  { %3052 = vmatpush3.bf16.msra.mxu0 %v3329_v11 }
 0x1c0   :  { %3053 = vmatprep.subr.bf16.mxu0 %v3330_v23 }
 0x1c3   :  { %3054 = vmatpush3.bf16.msra.mxu0 %v3330_v23 }
 0x1c4   :  { %3055 = vmatprep.subr.bf16.mxu0 %v3331_v19 }
 0x1c7   :  { %3056 = vmatpush3.bf16.msra.mxu0 %v3331_v19 }
 0x1c8   :  { %3085 = vmatprep.subr.bf16.mxu0 %v3401_v47 }
 0x1ca   :  { %3058 = vmatmul.mubr.bf16.vlgmr.msra.gmra.mrb[16].mxu0 %v477_v20 }
 0x1cb   :  { %3086 = vmatpush3.bf16.msra.mxu0 %v3333_v58  ;;  %3093 = vmatprep.mubr.msk.bf16.mxu0 %vm3402_vm13, %v3401_v47 }
 0x1cc   :  { %3087 = vmatprep.subr.bf16.mxu0 %v3401_v47 }
 0x1cf   :  { %3088 = vmatpush3.bf16.msra.mxu0 %v3335_v51 }
 0x1d0   :  { %3089 = vmatprep.subr.bf16.mxu0 %v3401_v47 }
 0x1d3   :  { %3090 = vmatpush3.bf16.msra.mxu0 %v3337_v5 }
 0x1d4   :  { %3091 = vmatprep.subr.bf16.mxu0 %v3401_v47 }
 0x1d7   :  { %3092 = vmatpush3.bf16.msra.mxu0 %v3339_v17 }
 0x1d8   :  { %3109 = vmatprep.subr.bf16.mxu0 %v3401_v47 }
 0x25a   :  { %v2855_v32 = vpop.f32.mrb[0].mxu0 }
 0x25b   :  { %v2856_v61 = vpop.f32.mrb[1].mxu0 }
 0x25c   :  { %v2857_v43 = vadd.f32 %v2856_v61, %v2855_v32  ;;  %v2858_v4 = vpop.f32.mrb[2].mxu0 }
 0x25d   :  { %v2859_v33 = vpop.f32.mrb[3].mxu0 }
 0x25e   :  { %v1096_v46 = vadd.f32 %v2857_v43, %v2683_v21  ;;  %v2860_v53 = vadd.f32 %v2859_v33, %v2858_v4 }
 0x25f   :  { %v2883_v6 = vpop.f32.mrb[0].mxu1 }
 0x260   :  { %v2884_v28 = vpop.f32.mrb[1].mxu1  ;;  %v1099_v14 = vadd.f32 %v2860_v53, %v2683_v21 }
 0x261   :  { %v2885_v7 = vadd.f32 %v2884_v28, %v2883_v6  ;;  %v2886_v37 = vpop.f32.mrb[2].mxu1 }
 0x262   :  { %v2887_v18 = vpop.f32.mrb[3].mxu1 }
 0x263   :  { %v1145_v45 = vadd.f32 %v2885_v7, %v1096_v46  ;;  %v2888_v24 = vadd.f32 %v2887_v18, %v2886_v37 }
 0x265   :  { %v2861_v15 = vpop.f32.mrb[4].mxu0  ;;  %v1148_v42 = vadd.f32 %v2888_v24, %v1099_v14 }
 0x266   :  { %v2862_v49 = vpop.f32.mrb[5].mxu0 }
 0x267   :  { %v2863_v35 = vadd.f32 %v2862_v49, %v2861_v15  ;;  %v2864_v36 = vpop.f32.mrb[6].mxu0  ;;  %v2889_v50 = vpop.f32.mrb[4].mxu1 }
 0x268   :  { %v2865_v27 = vpop.f32.mrb[7].mxu0  ;;  %v2890_v34 = vpop.f32.mrb[5].mxu1 }
 0x269   :  { %v1104_v41 = vadd.f32 %v2863_v35, %v2683_v21  ;;  %v2866_v16 = vadd.f32 %v2865_v27, %v2864_v36  ;;  %v2891_v52 = vadd.f32 %v2890_v34, %v2889_v50  ;;  %v2892_v54 = vpop.f32.mrb[6].mxu1 }
 0x26a   :  { %v2893_v55 = vpop.f32.mrb[7].mxu1 }
 0x26b   :  { %v1107_v1 = vadd.f32 %v2866_v16, %v2683_v21  ;;  %v1153_v63 = vadd.f32 %v2891_v52, %v1104_v41  ;;  %v2894_v10 = vadd.f32 %v2893_v55, %v2892_v54 }
 0x26d   :  { %v1156_v13 = vadd.f32 %v2894_v10, %v1107_v1 }
 0x27c   :  { %v2911_v26 = vpop.f32.mrb[8].mxu0 }
 0x27d   :  { %v2912_v39 = vpop.f32.mrb[9].mxu0 }
 0x27e   :  { %v2913_v40 = vadd.f32 %v2912_v39, %v2911_v26  ;;  %v2914_v9 = vpop.f32.mrb[10].mxu0 }
 0x27f   :  { %v2939_v29 = vpop.f32.mrb[8].mxu1  ;;  %v2915_v44 = vpop.f32.mrb[11].mxu0 }
 0x280   :  { %v2940_v56 = vpop.f32.mrb[9].mxu1  ;;  %v1194_v60 = vadd.f32 %v2913_v40, %v1145_v45  ;;  %v2916_v38 = vadd.f32 %v2915_v44, %v2914_v9  ;;  %v3340_v40 = vld [vmem:[%s4633_s5] sm:$0xff]  }
 0x281   :  { %v2941_v31 = vadd.f32 %v2940_v56, %v2939_v29  ;;  %v2942_v30 = vpop.f32.mrb[10].mxu1  ;;  %v3341_v56 = vld [vmem:[%s4633_s5 + $0x80] sm:$0xff]  }
 0x282   :  { %v2943_v3 = vpop.f32.mrb[11].mxu1  ;;  %v1197_v0 = vadd.f32 %v2916_v38, %v1148_v42 }
 0x283   :  { %v2944_v12 = vadd.f32 %v2943_v3, %v2942_v30  ;;  %v1243_v11 = vadd.f32 %v2941_v31, %v1194_v60 }
 0x284   :  { %v2917_v23 = vpop.f32.mrb[12].mxu0 }
 0x285   :  { %v1246_v19 = vadd.f32 %v2944_v12, %v1197_v0  ;;  %v2918_v59 = vpop.f32.mrb[13].mxu0 }
 0x286   :  { %v2919_v8 = vadd.f32 %v2918_v59, %v2917_v23  ;;  %v2920_v22 = vpop.f32.mrb[14].mxu0 }
 0x287   :  { %v2945_v2 = vpop.f32.mrb[12].mxu1  ;;  %v2921_v57 = vpop.f32.mrb[15].mxu0 }
 0x288   :  { %v2946_v20 = vpop.f32.mrb[13].mxu1  ;;  %v1202_v58 = vadd.f32 %v2919_v8, %v1153_v63  ;;  %v2922_v62 = vadd.f32 %v2921_v57, %v2920_v22  ;;  %v3343_v8 = vld [vmem:[%s4633_s5 + $0x88] sm:$0xff]  }
 0x289   :  { %v2947_v48 = vadd.f32 %v2946_v20, %v2945_v2  ;;  %v2948_v51 = vpop.f32.mrb[14].mxu1  ;;  %v3342_v2 = vld [vmem:[%s4633_s5 + $0x8] sm:$0xff]  }
 0x28a   :  { %v2949_v5 = vpop.f32.mrb[15].mxu1  ;;  %v1205_v25 = vadd.f32 %v2922_v62, %v1156_v13 }
 0x28b   :  { %v2950_v17 = vadd.f32 %v2949_v5, %v2948_v51  ;;  %v1251_v32 = vadd.f32 %v2947_v48, %v1202_v58 }
 0x28d   :  { %v1254_v21 = vadd.f32 %v2950_v17, %v1205_v25 }
 0x29d   :  { %v3059_v61 = vpop.f32.mrb[16].mxu0 }
 0x29e   :  { %v1300_v43 = vadd.f32 %v3059_v61, %v1251_v32  ;;  %v1291_v4 = vpop.f32.mrb[17].mxu0  ;;  %v3345_v61 = vld [vmem:[%s4633_s5 + $0x90] sm:$0xff]  }
 0x29f   :  { %v1292_v6 = vadd.f32 %v1291_v4, %v1243_v11  ;;  %v3060_v33 = vpop.f32.mrb[18].mxu0 }
 0x2a0   :  { %vm1308_vm9 = vcmp.gt.f32.partialorder %v1300_v43, 0.0  ;;  %v1312_v46 = vmul.f32 0.2, %v1300_v43  ;;  %v1303_v28 = vadd.f32 %v3060_v33, %v1254_v21  ;;  %v1294_v53 = vpop.f32.mrb[19].mxu0  ;;  %v3344_v21 = vld [vmem:[%s4633_s5 + $0x10] sm:$0xff]  }
 0x2a1   :  { %vm1306_vm6 = vcmp.gt.f32.partialorder %v1292_v6, 0.0  ;;  %v1310_v7 = vmul.f32 0.2, %v1292_v6  ;;  %v1295_v37 = vadd.f32 %v1294_v53, %v1246_v19 }
 0x2a2   :  { %v1316_v14 = vsel %vm1308_vm9, %v1300_v43, %v1312_v46  ;;  %vm1309_vm2 = vcmp.gt.f32.partialorder %v1303_v28, 0.0  ;;  %v1313_v18 = vmul.f32 0.2, %v1303_v28 }
 0x2a3   :  { %v1319_v45 = vpack.c.bf16 %v1316_v14, %v1316_v14  ;;  %v1314_v24 = vsel %vm1306_vm6, %v1292_v6, %v1310_v7  ;;  %vm1307_vm8 = vcmp.gt.f32.partialorder %v1295_v37, 0.0  ;;  %v1311_v15 = vmul.f32 0.2, %v1295_v37 }
 0x2a4   :  { %v1318_v42 = vpack.c.bf16 %v1314_v24, %v1314_v24  ;;  %v1317_v49 = vsel %vm1309_vm2, %v1303_v28, %v1313_v18  ;;  %v3347_v24 = vld [vmem:[%s4633_s5 + $0x98] sm:$0xff]  }
 0x2a5   :  { %v1339_v35 = vunpack.c.l.b16 %v1319_v45  ;;  %v1963_v36 = vpack.c.bf16 %v1317_v49, %v1317_v49  ;;  %v1315_v50 = vsel %vm1307_vm8, %v1295_v37, %v1311_v15  ;;  %v3346_v45 = vld [vmem:[%s4633_s5 + $0x18] sm:$0xff]   ;;  %v3349_v49 = vld [vmem:[%s4633_s5 + $0xc0] sm:$0xff]  }
 0x2a6   :  { %v1338_v27 = vunpack.c.l.b16 %v1318_v42  ;;  %v1962_v41 = vpack.c.bf16 %v1315_v50, %v1315_v50  ;;  %v3348_v42 = vld [vmem:[%s4633_s5 + $0x60] sm:$0xff]   ;;  %v3350_v50 = vld [vmem:[%s4633_s5 + $0x68] sm:$0xff]  }
 0x2a7   :  { %v1491_v34 = vrot.slane %v1339_v35, 1  ;;  %v1412_v16 = vrot.slane %v1339_v35, 7  ;;  %v1651_v52 = vrot.slane %v1339_v35, 3  ;;  %v4259_v54 = vunpack.c.l.b16 %v1963_v36 }
 0x2a8   :  { %v1340_v1 = vrot.slane %v1338_v27, 1  ;;  %v1490_v55 = vrot.slane %v1338_v27, 2  ;;  %v1650_v63 = vrot.slane %v1338_v27, 4  ;;  %v4261_v10 = vunpack.c.l.b16 %v1962_v41  ;;  %v3352_v41 = vld [vmem:[%s4633_s5 + $0x70] sm:$0xff]  }
 0x2a9   :  { %v4264_v13 = vsel %vm1341_vm4, %v1412_v16, %v1338_v27  ;;  %v1570_v26 = vrot.slane %v1338_v27, 3  ;;  %v1571_v39 = vrot.slane %v1339_v35, 2  ;;  %v1810_v60 = vrot.slane %v1338_v27, 6  ;;  %v3354_v16 = vld [vmem:[%s4633_s5 + $0x78] sm:$0xff]  }
 0x2aa   :  { %v1342_v29 = vsel %vm1341_vm4, %v1339_v35, %v1340_v1  ;;  %v1492_v9 = vsel %vm1341_vm4, %v1491_v34, %v1490_v55  ;;  %v4275_v44 = vsel %vm1341_vm4, %v1651_v52, %v1650_v63  ;;  %v1811_v3 = vrot.slane %v1339_v35, 5  ;;  %v3353_v34 = vld [vmem:[%s4633_s5 + $0xd0] sm:$0xff]   ;;  %v3355_v52 = vld [vmem:[%s4633_s5 + $0xd8] sm:$0xff]   ;;  %v3357_v1 = vld [vmem:[%s4633_s5 + $0x100] sm:$0xff]  }
 0x2ab   :  { %v1343_v31 = vpack.c.b16 %v1342_v29, %v1342_v29  ;;  %v1493_v30 = vpack.c.b16 %v1492_v9, %v1492_v9  ;;  %v4278_v38 = vsel %vm1341_vm4, %v1571_v39, %v1570_v26  ;;  %v1730_v0 = vrot.slane %v1338_v27, 5  ;;  %v3360_v26 = vld [vmem:[%s4633_s5 + $0xb0] sm:$0xff]   ;;  %v3362_v29 = vld [vmem:[%s4633_s5 + $0xb8] sm:$0xff]   ;;  %v3364_v9 = vld [vmem:[%s4633_s5 + $0xe0] sm:$0xff]  }
 0x2ac   :  { %v1731_v12 = vrot.slane %v1339_v35, 4  ;;  %v1976_v11 = vrot.slane %v4259_v54, 7  ;;  %v1890_v23 = vrot.slane %v1338_v27, 7  ;;  %v1891_v19 = vrot.slane %v1339_v35, 6  ;;  %v3351_v27 = vld [vmem:[%s4633_s5 + $0xc8] sm:$0xff]   ;;  %v3361_v39 = vld [vmem:[%s4633_s5 + $0x110] sm:$0xff]  }
 0x2ad   :  { %3070 = vmatmul.mubr.msk.bf16.vlgmr.msra.gmra.mrb[16].mxu1 %vm1368_vm10, %v1343_v31  ;;  %3094 = vmatmul.mubr.msk.bf16.vlgmr.msra.gmra.mrb[20].mxu0 %vm1368_vm10, %v1493_v30  ;;  %v2134_v59 = vrot.slane %v4261_v10, 2  ;;  %v4291_v22 = vsel %vm1341_vm4, %v1811_v3, %v1810_v60  ;;  %v2135_v57 = vrot.slane %v4259_v54, 1  ;;  %v2055_v58 = vrot.slane %v4261_v10, 1  ;;  %v3366_v31 = vld [vmem:[%s4633_s5 + $0xe8] sm:$0xff]   ;;  %v3369_v3 = vld [vmem:[%s4633_s5 + $0x150] sm:$0xff]  }
 0x2ae   :  { %3074 = vmatpush3.bf16.msra.mxu1 %v3340_v40  ;;  %3110 = vmatpush3.bf16.msra.mxu0 %v3341_v56  ;;  %v4294_v20 = vsel %vm1341_vm4, %v1731_v12, %v1730_v0  ;;  %v4302_v48 = vsel %vm1341_vm4, %v1976_v11, %v4261_v10  ;;  %v2294_v51 = vrot.slane %v4261_v10, 4  ;;  %v4310_v62 = vsel %vm1341_vm4, %v1891_v19, %v1890_v23  ;;  %v3363_v40 = vld [vmem:[%s4633_s5 + $0x118] sm:$0xff]   ;;  %v3365_v56 = vld [vmem:[%s4633_s5 + $0x140] sm:$0xff]   ;;  %v3367_v30 = vld [vmem:[%s4633_s5 + $0x148] sm:$0xff]  }
 0x2af   :  { %3075 = vmatprep.subr.bf16.mxu1 %v3401_v47  ;;  %3111 = vmatprep.subr.bf16.mxu0 %v3401_v47  ;;  %v4313_v5 = vsel %vm1341_vm4, %v2135_v57, %v2134_v59  ;;  %v2295_v25 = vrot.slane %v4259_v54, 3  ;;  %v4318_v17 = vsel %vm1341_vm4, %v4259_v54, %v2055_v58  ;;  %v2214_v32 = vrot.slane %v4261_v10, 3  ;;  %v3370_v0 = vld [vmem:[%s4633_s5 + $0xf8] sm:$0xff]   ;;  %v3372_v11 = vld [vmem:[%s4633_s5 + $0x120] sm:$0xff]  }
 0x2b0   :  { %3081 = vmatprep.mubr.msk.bf16.mxu1 %vm3402_vm13, %v3401_v47  ;;  %3117 = vmatprep.mubr.msk.bf16.mxu0 %vm3402_vm13, %v3401_v47  ;;  %v2215_v4 = vrot.slane %v4259_v54, 2  ;;  %v2454_v6 = vrot.slane %v4261_v10, 6  ;;  %v2455_v33 = vrot.slane %v4259_v54, 5  ;;  %v2374_v46 = vrot.slane %v4261_v10, 5  ;;  %v3371_v12 = vld [vmem:[%s4633_s5 + $0x158] sm:$0xff]   ;;  %v3373_v23 = vld [vmem:[%s4633_s5 + $0x180] sm:$0xff]  }
 0x2b1   :  { %v4328_v43 = vsel %vm1341_vm4, %v2295_v25, %v2294_v51  ;;  %v2375_v28 = vrot.slane %v4259_v54, 4  ;;  %v2534_v7 = vrot.slane %v4261_v10, 7  ;;  %v2535_v37 = vrot.slane %v4259_v54, 6  ;;  %v3356_v54 = vld [vmem:[%s4633_s5 + $0xa0] sm:$0xff]   ;;  %v3358_v10 = vld [vmem:[%s4633_s5 + $0xa8] sm:$0xff]   ;;  %v3378_v57 = vld [vmem:[%s4633_s5 + $0x138] sm:$0xff]  }
 0x2b2   :  { %3076 = vmatpush3.bf16.msra.mxu1 %v3342_v2  ;;  %3112 = vmatpush3.bf16.msra.mxu0 %v3343_v8  ;;  %v4338_v53 = vsel %vm1341_vm4, %v2215_v4, %v2214_v32  ;;  %v4343_v14 = vsel %vm1341_vm4, %v2455_v33, %v2454_v6  ;;  %v1414_v35 = vpack.c.b16 %v4264_v13, %v4264_v13  ;;  %v3359_v13 = vld [vmem:[%s4633_s5 + $0x108] sm:$0xff]   ;;  %v3379_v58 = vld [vmem:[%s4633_s5 + $0x198] sm:$0xff]   ;;  %v3381_v51 = vld [vmem:[%s4633_s5 + $0x1c0] sm:$0xff]  }
 0x2b3   :  { %3077 = vmatprep.subr.bf16.mxu1 %v3401_v47  ;;  %3113 = vmatprep.subr.bf16.mxu0 %v3401_v47  ;;  %v4346_v18 = vsel %vm1341_vm4, %v2375_v28, %v2374_v46  ;;  %v4355_v15 = vsel %vm1341_vm4, %v2535_v37, %v2534_v7  ;;  %v1653_v36 = vpack.c.b16 %v4275_v44, %v4275_v44  ;;  %v3374_v2 = vld [vmem:[%s4633_s5 + $0x128] sm:$0xff]   ;;  %v3384_v32 = vld [vmem:[%s4633_s5 + $0x170] sm:$0xff]   ;;  %v3388_v4 = vld [vmem:[%s4633_s5 + $0x1a0] sm:$0xff]  }
 0x2b4   :  { %v1573_v55 = vpack.c.b16 %v4278_v38, %v4278_v38  ;;  %v1813_v63 = vpack.c.b16 %v4291_v22, %v4291_v22  ;;  %v1733_v44 = vpack.c.b16 %v4294_v20, %v4294_v20  ;;  %v1978_v60 = vpack.c.b16 %v4302_v48, %v4302_v48  ;;  %v3368_v38 = vld [vmem:[%s4633_s5 + $0xf0] sm:$0xff]   ;;  %v3375_v8 = vld [vmem:[%s4633_s5 + $0x188] sm:$0xff]   ;;  %v3380_v48 = vld [vmem:[%s4633_s5 + $0x160] sm:$0xff]  }
 0x2b5   :  { %v1893_v19 = vpack.c.b16 %v4310_v62, %v4310_v62  ;;  %v2137_v59 = vpack.c.b16 %v4313_v5, %v4313_v5  ;;  %v3376_v22 = vld [vmem:[%s4633_s5 + $0x130] sm:$0xff]   ;;  %v2057_v62 = vpack.c.b16 %v4318_v17, %v4318_v17  ;;  %v2297_v5 = vpack.c.b16 %v4328_v43, %v4328_v43  ;;  %v3382_v25 = vld [vmem:[%s4633_s5 + $0x168] sm:$0xff]   ;;  %v3387_v43 = vld [vmem:[%s4633_s5 + $0x1d8] sm:$0xff]  }
 0x2b6   :  { %3078 = vmatpush3.bf16.msra.mxu1 %v3344_v21  ;;  %3114 = vmatpush3.bf16.msra.mxu0 %v3345_v61  ;;  %v3377_v20 = vld [vmem:[%s4633_s5 + $0x190] sm:$0xff]   ;;  %v3383_v17 = vld [vmem:[%s4633_s5 + $0x1c8] sm:$0xff]   ;;  %v3386_v61 = vld [vmem:[%s4633_s5 + $0x178] sm:$0xff]   ;;  %v2217_v6 = vpack.c.b16 %v4338_v53, %v4338_v53  ;;  %v2457_v33 = vpack.c.b16 %v4343_v14, %v4343_v14  ;;  %v2377_v37 = vpack.c.b16 %v4346_v18, %v4346_v18 }
 0x2b7   :  { %3079 = vmatprep.subr.bf16.mxu1 %v3401_v47  ;;  %3115 = vmatprep.subr.bf16.mxu0 %v3401_v47  ;;  %v3385_v21 = vld [vmem:[%s4633_s5 + $0x1d0] sm:$0xff]   ;;  %v3389_v46 = vld [vmem:[%s4633_s5 + $0x1a8] sm:$0xff]   ;;  %v3391_v53 = vld [vmem:[%s4633_s5 + $0x1b8] sm:$0xff]  }
 0x2b8   :  { %v3390_v28 = vld [vmem:[%s4633_s5 + $0x1b0] sm:$0xff]   ;;  %v3392_v7 = vld [vmem:[%s4633_s5 + $0x1e0] sm:$0xff]   ;;  %v3393_v14 = vld [vmem:[%s4633_s5 + $0x1e8] sm:$0xff]  }
 0x2b9   :  { %v3395_v18 = vld [vmem:[%s4633_s5 + $0x1f8] sm:$0xff]  }
 0x2ba   :  { %3080 = vmatpush3.bf16.msra.mxu1 %v3346_v45  ;;  %3116 = vmatpush3.bf16.msra.mxu0 %v3347_v24  ;;  %v3394_v45 = vld [vmem:[%s4633_s5 + $0x1f0] sm:$0xff]   ;;  %v2537_v24 = vpack.c.b16 %v4355_v15, %v4355_v15 }
 0x2bb   :  { %3097 = vmatprep.subr.bf16.mxu1 %v3401_v47  ;;  %3133 = vmatprep.subr.bf16.mxu0 %v3401_v47 }
 0x2bd   :  { %3082 = vmatmul.mubr.msk.bf16.vlgmr.msra.gmra.mrb[20].mxu1 %vm1368_vm10, %v1414_v35  ;;  %3118 = vmatmul.mubr.msk.bf16.vlgmr.msra.gmra.mrb[24].mxu0 %vm1368_vm10, %v1653_v36 }
 0x2be   :  { %3098 = vmatpush3.bf16.msra.mxu1 %v3348_v42  ;;  %3134 = vmatpush3.bf16.msra.mxu0 %v3349_v49 }
 0x2bf   :  { %3099 = vmatprep.subr.bf16.mxu1 %v3401_v47  ;;  %3135 = vmatprep.subr.bf16.mxu0 %v3401_v47 }
 0x2c0   :  { %3105 = vmatprep.mubr.msk.bf16.mxu1 %vm3402_vm13, %v3401_v47  ;;  %3141 = vmatprep.mubr.msk.bf16.mxu0 %vm3402_vm13, %v3401_v47 }
 0x2c2   :  { %3100 = vmatpush3.bf16.msra.mxu1 %v3350_v50  ;;  %3136 = vmatpush3.bf16.msra.mxu0 %v3351_v27 }
 0x2c3   :  { %3101 = vmatprep.subr.bf16.mxu1 %v3401_v47  ;;  %3137 = vmatprep.subr.bf16.mxu0 %v3401_v47 }
 0x2c6   :  { %3102 = vmatpush3.bf16.msra.mxu1 %v3352_v41  ;;  %3138 = vmatpush3.bf16.msra.mxu0 %v3353_v34 }
 0x2c7   :  { %3103 = vmatprep.subr.bf16.mxu1 %v3401_v47  ;;  %3139 = vmatprep.subr.bf16.mxu0 %v3401_v47 }
 0x2ca   :  { %3104 = vmatpush3.bf16.msra.mxu1 %v3354_v16  ;;  %3140 = vmatpush3.bf16.msra.mxu0 %v3355_v52  ;;  %v14_v16 = vstv %s4635_s8 }
 0x2cb   :  { %3121 = vmatprep.subr.bf16.mxu1 %v3401_v47  ;;  %3157 = vmatprep.subr.bf16.mxu0 %v3401_v47  ;;  %15 = vst [vmem:[#allocation2] sm:$0x1] %v14_v16 }
 0x2cd   :  { %3106 = vmatmul.mubr.msk.bf16.vlgmr.msra.gmra.mrb[24].mxu1 %vm1368_vm10, %v1573_v55  ;;  %3142 = vmatmul.mubr.msk.bf16.vlgmr.msra.gmra.mrb[28].mxu0 %vm1368_vm10, %v1813_v63 }
 0x2ce   :  { %3122 = vmatpush3.bf16.msra.mxu1 %v3356_v54  ;;  %3158 = vmatpush3.bf16.msra.mxu0 %v3357_v1 }
 0x2cf   :  { %3123 = vmatprep.subr.bf16.mxu1 %v3401_v47  ;;  %3159 = vmatprep.subr.bf16.mxu0 %v3401_v47 }
 0x2d0   :  { %3129 = vmatprep.mubr.msk.bf16.mxu1 %vm3402_vm13, %v3401_v47  ;;  %3165 = vmatprep.mubr.msk.bf16.mxu0 %vm3402_vm13, %v3401_v47 }
 0x2d2   :  { %3124 = vmatpush3.bf16.msra.mxu1 %v3358_v10  ;;  %3160 = vmatpush3.bf16.msra.mxu0 %v3359_v13 }
 0x2d3   :  { %3125 = vmatprep.subr.bf16.mxu1 %v3401_v47  ;;  %3161 = vmatprep.subr.bf16.mxu0 %v3401_v47 }
 0x2d6   :  { %3126 = vmatpush3.bf16.msra.mxu1 %v3360_v26  ;;  %3162 = vmatpush3.bf16.msra.mxu0 %v3361_v39 }
 0x2d7   :  { %3127 = vmatprep.subr.bf16.mxu1 %v3401_v47  ;;  %3163 = vmatprep.subr.bf16.mxu0 %v3401_v47 }
 0x2da   :  { %3128 = vmatpush3.bf16.msra.mxu1 %v3362_v29  ;;  %3164 = vmatpush3.bf16.msra.mxu0 %v3363_v40 }
 0x2db   :  { %3145 = vmatprep.subr.bf16.mxu1 %v3401_v47  ;;  %3181 = vmatprep.subr.bf16.mxu0 %v3401_v47 }
 0x2dd   :  { %3130 = vmatmul.mubr.msk.bf16.vlgmr.msra.gmra.mrb[28].mxu1 %vm1368_vm10, %v1733_v44  ;;  %3166 = vmatmul.mubr.msk.bf16.vlgmr.msra.gmra.mrb[32].mxu0 %vm1368_vm10, %v1978_v60 }
 0x2de   :  { %3146 = vmatpush3.bf16.msra.mxu1 %v3364_v9  ;;  %3182 = vmatpush3.bf16.msra.mxu0 %v3365_v56 }
 0x2df   :  { %3147 = vmatprep.subr.bf16.mxu1 %v3401_v47  ;;  %3183 = vmatprep.subr.bf16.mxu0 %v3401_v47 }
 0x2e0   :  { %3153 = vmatprep.mubr.msk.bf16.mxu1 %vm3402_vm13, %v3401_v47  ;;  %3189 = vmatprep.mubr.msk.bf16.mxu0 %vm3402_vm13, %v3401_v47 }
 0x2e2   :  { %3148 = vmatpush3.bf16.msra.mxu1 %v3366_v31  ;;  %3184 = vmatpush3.bf16.msra.mxu0 %v3367_v30 }
 0x2e3   :  { %3149 = vmatprep.subr.bf16.mxu1 %v3401_v47  ;;  %3185 = vmatprep.subr.bf16.mxu0 %v3401_v47 }
 0x2e6   :  { %3150 = vmatpush3.bf16.msra.mxu1 %v3368_v38  ;;  %3186 = vmatpush3.bf16.msra.mxu0 %v3369_v3 }
 0x2e7   :  { %3151 = vmatprep.subr.bf16.mxu1 %v3401_v47  ;;  %3187 = vmatprep.subr.bf16.mxu0 %v3401_v47 }
 0x2ea   :  { %3152 = vmatpush3.bf16.msra.mxu1 %v3370_v0  ;;  %3188 = vmatpush3.bf16.msra.mxu0 %v3371_v12 }
 0x2eb   :  { %3169 = vmatprep.subr.bf16.mxu1 %v3401_v47  ;;  %3205 = vmatprep.subr.bf16.mxu0 %v3401_v47 }
 0x2ed   :  { %3154 = vmatmul.mubr.msk.bf16.vlgmr.msra.gmra.mrb[32].mxu1 %vm1368_vm10, %v1893_v19  ;;  %3190 = vmatmul.mubr.msk.bf16.vlgmr.msra.gmra.mrb[36].mxu0 %vm1368_vm10, %v2137_v59 }
 0x2ee   :  { %3170 = vmatpush3.bf16.msra.mxu1 %v3372_v11  ;;  %3206 = vmatpush3.bf16.msra.mxu0 %v3373_v23 }
 0x2ef   :  { %3171 = vmatprep.subr.bf16.mxu1 %v3401_v47  ;;  %3207 = vmatprep.subr.bf16.mxu0 %v3401_v47 }
 0x2f0   :  { %3177 = vmatprep.mubr.msk.bf16.mxu1 %vm3402_vm13, %v3401_v47  ;;  %3213 = vmatprep.mubr.msk.bf16.mxu0 %vm3402_vm13, %v3401_v47 }
 0x2f2   :  { %3172 = vmatpush3.bf16.msra.mxu1 %v3374_v2  ;;  %3208 = vmatpush3.bf16.msra.mxu0 %v3375_v8 }
 0x2f3   :  { %3173 = vmatprep.subr.bf16.mxu1 %v3401_v47  ;;  %3209 = vmatprep.subr.bf16.mxu0 %v3401_v47 }
 0x2f6   :  { %3174 = vmatpush3.bf16.msra.mxu1 %v3376_v22  ;;  %3210 = vmatpush3.bf16.msra.mxu0 %v3377_v20 }
 0x2f7   :  { %3175 = vmatprep.subr.bf16.mxu1 %v3401_v47  ;;  %3211 = vmatprep.subr.bf16.mxu0 %v3401_v47 }
 0x2fa   :  { %3176 = vmatpush3.bf16.msra.mxu1 %v3378_v57  ;;  %3212 = vmatpush3.bf16.msra.mxu0 %v3379_v58 }
 0x2fb   :  { %3193 = vmatprep.subr.bf16.mxu1 %v3401_v47  ;;  %3229 = vmatprep.subr.bf16.mxu0 %v3401_v47 }
 0x2fd   :  { %3178 = vmatmul.mubr.msk.bf16.vlgmr.msra.gmra.mrb[36].mxu1 %vm1368_vm10, %v2057_v62  ;;  %3214 = vmatmul.mubr.msk.bf16.vlgmr.msra.gmra.mrb[40].mxu0 %vm1368_vm10, %v2297_v5 }
 0x2fe   :  { %3194 = vmatpush3.bf16.msra.mxu1 %v3380_v48  ;;  %3230 = vmatpush3.bf16.msra.mxu0 %v3381_v51 }
 0x2ff   :  { %3195 = vmatprep.subr.bf16.mxu1 %v3401_v47  ;;  %3231 = vmatprep.subr.bf16.mxu0 %v3401_v47 }
 0x300   :  { %3201 = vmatprep.mubr.msk.bf16.mxu1 %vm3402_vm13, %v3401_v47  ;;  %3237 = vmatprep.mubr.msk.bf16.mxu0 %vm3402_vm13, %v3401_v47 }
 0x302   :  { %3196 = vmatpush3.bf16.msra.mxu1 %v3382_v25  ;;  %3232 = vmatpush3.bf16.msra.mxu0 %v3383_v17 }
 0x303   :  { %3197 = vmatprep.subr.bf16.mxu1 %v3401_v47  ;;  %3233 = vmatprep.subr.bf16.mxu0 %v3401_v47 }
 0x306   :  { %3198 = vmatpush3.bf16.msra.mxu1 %v3384_v32  ;;  %3234 = vmatpush3.bf16.msra.mxu0 %v3385_v21 }
 0x307   :  { %3199 = vmatprep.subr.bf16.mxu1 %v3401_v47  ;;  %3235 = vmatprep.subr.bf16.mxu0 %v3401_v47 }
 0x30a   :  { %3200 = vmatpush3.bf16.msra.mxu1 %v3386_v61  ;;  %3236 = vmatpush3.bf16.msra.mxu0 %v3387_v43 }
 0x30b   :  { %3217 = vmatprep.subr.bf16.mxu1 %v3401_v47 }
 0x30d   :  { %3202 = vmatmul.mubr.msk.bf16.vlgmr.msra.gmra.mrb[40].mxu1 %vm1368_vm10, %v2217_v6  ;;  %3238 = vmatmul.mubr.msk.bf16.vlgmr.msra.gmra.mrb[44].mxu0 %vm1368_vm10, %v2457_v33 }
 0x30e   :  { %3218 = vmatpush3.bf16.msra.mxu1 %v3388_v4  ;;  %3225 = vmatprep.mubr.msk.bf16.mxu1 %vm3402_vm13, %v3401_v47 }
 0x30f   :  { %3219 = vmatprep.subr.bf16.mxu1 %v3401_v47 }
 0x312   :  { %3220 = vmatpush3.bf16.msra.mxu1 %v3389_v46 }
 0x313   :  { %3221 = vmatprep.subr.bf16.mxu1 %v3401_v47 }
 0x316   :  { %3222 = vmatpush3.bf16.msra.mxu1 %v3390_v28 }
 0x317   :  { %3223 = vmatprep.subr.bf16.mxu1 %v3401_v47 }
 0x31a   :  { %3224 = vmatpush3.bf16.msra.mxu1 %v3391_v53 }
 0x31b   :  { %3241 = vmatprep.subr.bf16.mxu1 %v3401_v47 }
 0x31d   :  { %3226 = vmatmul.mubr.msk.bf16.vlgmr.msra.gmra.mrb[44].mxu1 %vm1368_vm10, %v2377_v37 }
 0x31e   :  { %3242 = vmatpush3.bf16.msra.mxu1 %v3392_v7  ;;  %3249 = vmatprep.mubr.msk.bf16.mxu1 %vm3402_vm13, %v3401_v47 }
 0x31f   :  { %3243 = vmatprep.subr.bf16.mxu1 %v3401_v47 }
 0x322   :  { %3244 = vmatpush3.bf16.msra.mxu1 %v3393_v14 }
 0x323   :  { %3245 = vmatprep.subr.bf16.mxu1 %v3401_v47 }
 0x326   :  { %3246 = vmatpush3.bf16.msra.mxu1 %v3394_v45 }
 0x327   :  { %3247 = vmatprep.subr.bf16.mxu1 %v3401_v47 }
 0x32a   :  { %3248 = vmatpush3.bf16.msra.mxu1 %v3395_v18 }
 0x32d   :  { %3250 = vmatmul.mubr.msk.bf16.vlgmr.msra.gmra.mrb[48].mxu1 %vm1368_vm10, %v2537_v24 }
 0x380   :  { %v1406_v42 = vpop.f32.mrb[16].mxu1  ;;  %v1555_v49 = vpop.f32.mrb[20].mxu0 }
 0x381   :  { %v3071_v35 = vpop.f32.mrb[17].mxu1  ;;  %v3095_v36 = vpop.f32.mrb[21].mxu0 }
 0x382   :  { %v1409_v50 = vpop.f32.mrb[18].mxu1  ;;  %v1558_v27 = vpop.f32.mrb[22].mxu0 }
 0x383   :  { %v3072_v41 = vpop.f32.mrb[19].mxu1  ;;  %v3096_v34 = vpop.f32.mrb[23].mxu0 }
 0x390   :  { %v1476_v47 = vpop.f32.mrb[20].mxu1  ;;  %v1715_v52 = vpop.f32.mrb[24].mxu0 }
 0x391   :  { %v1477_v54 = vadd.f32 %v1476_v47, %v1406_v42  ;;  %v3083_v1 = vpop.f32.mrb[21].mxu1  ;;  %v3119_v15 = vpop.f32.mrb[25].mxu0 }
 0x392   :  { %v1479_v55 = vpop.f32.mrb[22].mxu1  ;;  %v1718_v63 = vpop.f32.mrb[26].mxu0  ;;  %v2836_v1 = vld [vmem:[%s4636_s6] ss:$0 sm:$0xff] }
 0x393   :  { %v3084_v10 = vpop.f32.mrb[23].mxu1  ;;  %v3120_v13 = vpop.f32.mrb[27].mxu0  ;;  %v1561_v26 = vadd.f32 %v1555_v49, %v1477_v54 }
 0x3a0   :  { %v1635_v39 = vpop.f32.mrb[24].mxu1  ;;  %v1875_v29 = vpop.f32.mrb[28].mxu0 }
 0x3a1   :  { %v1641_v40 = vadd.f32 %v1635_v39, %v1561_v26  ;;  %v3107_v9 = vpop.f32.mrb[25].mxu1  ;;  %v3143_v56 = vpop.f32.mrb[29].mxu0  ;;  %v2837_v39 = vld [vmem:[%s4637_s7] ss:$0 sm:$0xff] }
 0x3a2   :  { %v1638_v44 = vpop.f32.mrb[26].mxu1  ;;  %v1878_v60 = vpop.f32.mrb[30].mxu0  ;;  %v2838_v56 = vld [vmem:[#allocation2] ss:$0 sm:$0xff] }
 0x3a3   :  { %v3108_v31 = vpop.f32.mrb[27].mxu1  ;;  %v3144_v30 = vpop.f32.mrb[31].mxu0  ;;  %v1721_v38 = vadd.f32 %v1715_v52, %v1641_v40 }
 0x3b0   :  { %v1795_v3 = vpop.f32.mrb[28].mxu1  ;;  %v2040_v0 = vpop.f32.mrb[32].mxu0 }
 0x3b1   :  { %v1801_v12 = vadd.f32 %v1795_v3, %v1721_v38  ;;  %v3131_v11 = vpop.f32.mrb[29].mxu1  ;;  %v3167_v23 = vpop.f32.mrb[33].mxu0 }
 0x3b2   :  { %v1798_v19 = vpop.f32.mrb[30].mxu1  ;;  %v2043_v59 = vpop.f32.mrb[34].mxu0 }
 0x3b3   :  { %v3132_v2 = vpop.f32.mrb[31].mxu1  ;;  %v3168_v8 = vpop.f32.mrb[35].mxu0  ;;  %v1881_v22 = vadd.f32 %v1875_v29, %v1801_v12 }
 0x3c0   :  { %v1955_v20 = vpop.f32.mrb[32].mxu1  ;;  %v2199_v57 = vpop.f32.mrb[36].mxu0 }
 0x3c1   :  { %v1961_v58 = vadd.f32 %v1955_v20, %v1881_v22  ;;  %v3155_v48 = vpop.f32.mrb[33].mxu1  ;;  %v3191_v51 = vpop.f32.mrb[37].mxu0 }
 0x3c2   :  { %v1958_v62 = vpop.f32.mrb[34].mxu1  ;;  %v2202_v5 = vpop.f32.mrb[38].mxu0 }
 0x3c3   :  { %v3156_v25 = vpop.f32.mrb[35].mxu1  ;;  %v3192_v17 = vpop.f32.mrb[39].mxu0  ;;  %v2046_v32 = vadd.f32 %v2040_v0, %v1961_v58 }
 0x3d0   :  { %v2119_v21 = vpop.f32.mrb[36].mxu1  ;;  %v2359_v61 = vpop.f32.mrb[40].mxu0 }
 0x3d1   :  { %v2125_v43 = vadd.f32 %v2119_v21, %v2046_v32  ;;  %v3179_v4 = vpop.f32.mrb[37].mxu1  ;;  %v3215_v6 = vpop.f32.mrb[41].mxu0 }
 0x3d2   :  { %v2122_v33 = vpop.f32.mrb[38].mxu1  ;;  %v2362_v46 = vpop.f32.mrb[42].mxu0 }
 0x3d3   :  { %v3180_v28 = vpop.f32.mrb[39].mxu1  ;;  %v3216_v53 = vpop.f32.mrb[43].mxu0  ;;  %v2205_v7 = vadd.f32 %v2199_v57, %v2125_v43 }
 0x3e0   :  { %v2279_v37 = vpop.f32.mrb[40].mxu1  ;;  %v2519_v14 = vpop.f32.mrb[44].mxu0 }
 0x3e1   :  { %v2285_v45 = vadd.f32 %v2279_v37, %v2205_v7  ;;  %v3203_v18 = vpop.f32.mrb[41].mxu1  ;;  %v3239_v24 = vpop.f32.mrb[45].mxu0 }
 0x3e2   :  { %v2282_v42 = vpop.f32.mrb[42].mxu1  ;;  %v2522_v49 = vpop.f32.mrb[46].mxu0 }
 0x3e3   :  { %v3204_v35 = vpop.f32.mrb[43].mxu1  ;;  %v3240_v36 = vpop.f32.mrb[47].mxu0  ;;  %v2365_v50 = vadd.f32 %v2359_v61, %v2285_v45 }
 0x3f0   :  { %v2439_v27 = vpop.f32.mrb[44].mxu1 }
 0x3f1   :  { %v2445_v41 = vadd.f32 %v2439_v27, %v2365_v50  ;;  %v3227_v34 = vpop.f32.mrb[45].mxu1 }
 0x3f2   :  { %v2442_v16 = vpop.f32.mrb[46].mxu1 }
 0x3f3   :  { %v3228_v47 = vpop.f32.mrb[47].mxu1  ;;  %v2525_v52 = vadd.f32 %v2519_v14, %v2445_v41 }
 0x400   :  { %v2599_v54 = vpop.f32.mrb[48].mxu1 }
 0x401   :  { %v2605_v15 = vadd.f32 %v2599_v54, %v2525_v52  ;;  %v3251_v55 = vpop.f32.mrb[49].mxu1 }
 0x402   :  { %v2602_v63 = vpop.f32.mrb[50].mxu1 }
 0x403   :  { %v2613_v10 = vadd.f32 %v2836_v1, %v2605_v15  ;;  %v3252_v13 = vpop.f32.mrb[51].mxu1 }
 0x405   :  { %v2615_v26 = vmul.f32 0.2, %v2613_v10  ;;  %vm2614_vm3 = vcmp.gt.f32.partialorder %v2613_v10, 0.0 }
 0x407   :  { %v2616_v29 = vsel %vm2614_vm3, %v2613_v10, %v2615_v26 }
 0x408   :  { %v2624_v40 = vmul.f32 %v2837_v39, %v2616_v29 }
 0x40a   :  { %v2626_v9 = vsel %vm2625_vm15, %v2624_v40, 0.0 }
 0x40b   :  { %2627 = vadd.xlane.f32.xlu1 %v2626_v9 }
 0x498   :  { %v2628_v44 = vpop.xlane.xlu1 %2627 }
 0x499   :  { %v2636_v60 = vadd.f32 %v2838_v56, %v2628_v44 }
 0x49b   :  { %2638 = vst.msk [vmem:[%s4638_s9] sm:$0x3] %vm2637_vm14, %v2636_v60 }

</bundles_post_ra>
